<compile_context>
chip_gen: v6e
topology: v6e:2x2x1
jax: 0.10.0
libtpu: 0.0.40
codegen_flags: <defaults>
</compile_context>

<pallas_src>
import jax
import jax.numpy as jnp
from jax.experimental import pallas as pl
from jax.experimental.pallas import tpu as pltpu


def _relative_position_index(window_size: int) -> jnp.ndarray:
    """Replicates the torch buffer `relative_position_index` (N, N) int32."""
    coords_h = jnp.arange(window_size)
    coords_w = jnp.arange(window_size)
    coords = jnp.stack(jnp.meshgrid(coords_h, coords_w, indexing="ij"))  # (2, Wh, Ww)
    coords_flatten = coords.reshape(2, -1)                               # (2, N)
    relative_coords = coords_flatten[:, :, None] - coords_flatten[:, None, :]  # (2,N,N)
    relative_coords = jnp.transpose(relative_coords, (1, 2, 0))          # (N, N, 2)
    relative_coords = relative_coords.at[:, :, 0].add(window_size - 1)
    relative_coords = relative_coords.at[:, :, 1].add(window_size - 1)
    relative_coords = relative_coords.at[:, :, 0].multiply(2 * window_size - 1)
    return relative_coords.sum(-1).astype(jnp.int32)                     # (N, N)


def _window_attention_kernel(x_ref, wqkv_ref, bqkv_ref, wp_ref, bp_ref, rpb_ref,
                             o_ref, ctx_ref):
    """Processes TB windows per grid step.

    x_ref:    (TB, N, C)  bf16 activations
    wqkv_ref: (C, 3C)     bf16 fused qkv weight (softmax scale folded into q cols)
    bqkv_ref: (1, 3C)     f32 fused qkv bias (scale folded into q entries)
    wp_ref:   (C, C)      bf16 output projection weight
    bp_ref:   (1, C)      f32 output projection bias
    rpb_ref:  (H, N, N)   f32 relative position bias (pre-gathered)
    o_ref:    (TB, N, C)  output in x.dtype
    ctx_ref:  (TB*N, C)   bf16 VMEM scratch holding per-head contexts
    """
    TB, N, C = x_ref.shape
    H = rpb_ref.shape[0]
    hd = C // H
    f32 = jnp.float32

    x = x_ref[...].reshape(TB * N, C)          # merge leading dims: free

    # One fused QKV projection on the MXU: (TB*N, C) @ (C, 3C), f32 accumulate.
    qkv = jnp.dot(x, wqkv_ref[...], preferred_element_type=f32) + bqkv_ref[...]
    qkv = qkv.astype(x.dtype)                  # single downcast for the whole slab

    # TODO(synk): for real Swin configs with many heads (H up to 24), process
    # heads in small groups via lax.fori_loop(unroll=True) instead of a full
    # static unroll, to bound live ranges.
    for h in range(H):                         # static unroll; H is small here
        q = qkv[:, h * hd:(h + 1) * hd].reshape(TB, N, hd)
        k = qkv[:, C + h * hd:C + (h + 1) * hd].reshape(TB, N, hd)
        v = qkv[:, 2 * C + h * hd:2 * C + (h + 1) * hd].reshape(TB, N, hd)

        # Batched over TB windows (single batch dim, flash-attention pattern).
        logits = jnp.einsum("bnd,bmd->bnm", q, k,
                            preferred_element_type=f32)            # (TB, N, N)
        logits = logits + rpb_ref[h][None]                          # + (1, N, N)

        # Numerically stable softmax in f32; divide -> EUP reciprocal.
        m = jnp.max(logits, axis=-1, keepdims=True)
        p = jnp.exp(logits - m)
        denom = jnp.sum(p, axis=-1, keepdims=True)
        p = p * pl.reciprocal(denom, approx=True)

        ctx = jnp.einsum("bnm,bmd->bnd", p.astype(x.dtype), v,
                         preferred_element_type=f32)                # (TB, N, hd)

        # Park this head's context in its lane slice of the VMEM scratch.
        ctx_ref[:, h * hd:(h + 1) * hd] = (
            ctx.reshape(TB * N, hd).astype(ctx_ref.dtype))

    # Single full-width output projection: (TB*N, C) @ (C, C).
    out = jnp.dot(ctx_ref[...], wp_ref[...], preferred_element_type=f32) + bp_ref[...]
    o_ref[...] = out.reshape(TB, N, C).astype(o_ref.dtype)


def _default_vmem_limit():
    """Per-generation VMEM budget: ~3/4 of physical, capped at 96 MiB."""
    try:
        cap = pltpu.get_tpu_info().vmem_capacity_bytes
    except Exception:
        cap = 64 * 1024 * 1024            # conservative (v7x physical)
    return int(min(cap * 3 // 4, 96 * 1024 * 1024))


def _choose_windows_per_step(B, N, C, out_itemsize, vmem_limit, min_grid_steps=4):
    """Largest divisor TB of B whose TB*N rows fit the VMEM budget, while keeping
    >= min_grid_steps grid steps (2 TCs x double-buffering on v7x)."""
    # Approximate per-row VMEM bytes: double-buffered bf16 x and output blocks,
    # f32 qkv slab + bf16 qkv/ctx copies, f32 logits/probs for one live head.
    per_row = 2 * C * (2 + out_itemsize) + C * (4 * 3 + 2 * 3 + 2) + 8 * N
    target_rows = max(N, min(4096, (vmem_limit // 4) // per_row))
    divisors = [d for d in range(1, B + 1) if B % d == 0 and d * N <= target_rows]
    if not divisors:
        divisors = [1]
    for steps in (min_grid_steps, 2, 1):
        cand = [d for d in divisors if B // d >= steps]
        if cand:
            return max(cand)
    return max(divisors)


def prepare_params(params, *, window_size, num_heads, compute_dtype=jnp.bfloat16):
    """One-time parameter preprocessing (wrapper-side, free at run time)."""
    C = params["w_qkv"].shape[0]
    assert C % num_heads == 0
    hd = C // num_heads
    N = window_size * window_size
    scale = hd ** (-0.5)

    wqkv = params["w_qkv"]                    # (C, 3C), y = x @ w + b convention
    bqkv = params["b_qkv"]                    # (3C,)

    # Fold the softmax scale into the q columns / q bias entries.
    col_scale = jnp.concatenate(
        [jnp.full((C,), scale, dtype=wqkv.dtype),
         jnp.ones((2 * C,), dtype=wqkv.dtype)])
    wqkv = wqkv * col_scale[None, :]
    bqkv = bqkv * col_scale

    # Relative position bias gather, done once: (H, N, N) f32.
    rel_idx = _relative_position_index(window_size)
    rpb = params["rel_pos_bias_table"][rel_idx.reshape(-1)].reshape(N, N, num_heads)
    rpb = jnp.transpose(rpb, (2, 0, 1)).astype(jnp.float32)

    return {
        "wqkv": wqkv.astype(compute_dtype),                         # (C, 3C)
        "bqkv": bqkv.reshape(1, 3 * C).astype(jnp.float32),         # (1, 3C)
        "wp": params["w_proj"].astype(compute_dtype),               # (C, C)
        "bp": params["b_proj"].reshape(1, C).astype(jnp.float32),   # (1, C)
        "rpb": rpb,                                                  # (H, N, N)
    }


def window_attention(x, prep, *, window_size, num_heads,
                     windows_per_step=None, compute_dtype=jnp.bfloat16,
                     vmem_limit_bytes=None):
    """x: (B, N, C) with N == window_size**2.  Returns (B, N, C) in x.dtype."""
    B, N, C = x.shape
    assert N == window_size * window_size
    assert C % num_heads == 0
    H = num_heads

    vmem_limit = vmem_limit_bytes or _default_vmem_limit()
    TB = windows_per_step or _choose_windows_per_step(
        B, N, C, jnp.dtype(x.dtype).itemsize, vmem_limit)
    assert B % TB == 0, "batch must be divisible by windows_per_step"

    out = pl.pallas_call(
        _window_attention_kernel,
        out_shape=jax.ShapeDtypeStruct((B, N, C), x.dtype),
        grid_spec=pltpu.PrefetchScalarGridSpec(
            num_scalar_prefetch=0,
            grid=(B // TB,),
            in_specs=[
                pl.BlockSpec((TB, N, C), lambda b: (b, 0, 0)),      # x (bf16)
                pl.BlockSpec((C, 3 * C), lambda b: (0, 0)),         # fused W_qkv
                pl.BlockSpec((1, 3 * C), lambda b: (0, 0)),         # fused b_qkv
                pl.BlockSpec((C, C), lambda b: (0, 0)),             # W_proj
                pl.BlockSpec((1, C), lambda b: (0, 0)),             # b_proj
                pl.BlockSpec((H, N, N), lambda b: (0, 0, 0)),       # rel pos bias
            ],
            out_specs=pl.BlockSpec((TB, N, C), lambda b: (b, 0, 0)),
            scratch_shapes=[pltpu.VMEM((TB * N, C), compute_dtype)],
        ),
        compiler_params=pltpu.CompilerParams(
            dimension_semantics=("parallel",),
            vmem_limit_bytes=vmem_limit,
        ),
    )(x.astype(compute_dtype),
      prep["wqkv"], prep["bqkv"], prep["wp"], prep["bp"], prep["rpb"])
    return out


def _reference(x, params, *, window_size, num_heads):
    """Pure-JAX reference mirroring the PyTorch forward (dropout=0 => identity)."""
    B, N, C = x.shape
    hd = C // num_heads
    scale = hd ** (-0.5)

    qkv = x @ params["w_qkv"] + params["b_qkv"]                 # (B, N, 3C)
    qkv = qkv.reshape(B, N, 3, num_heads, hd)
    qkv = jnp.transpose(qkv, (2, 0, 3, 1, 4))                   # (3, B, H, N, hd)
    q, k, v = qkv[0], qkv[1], qkv[2]

    rel_idx = _relative_position_index(window_size)
    rpb = params["rel_pos_bias_table"][rel_idx.reshape(-1)].reshape(N, N, num_heads)
    rpb = jnp.transpose(rpb, (2, 0, 1))                         # (H, N, N)

    q = q * scale
    attn = jnp.einsum("bhnd,bhmd->bhnm", q, k) + rpb[None]
    attn = jax.nn.softmax(attn, axis=-1)
    ctx = jnp.einsum("bhnm,bhmd->bhnd", attn, v)
    ctx = jnp.transpose(ctx, (0, 2, 1, 3)).reshape(B, N, C)
    return ctx @ params["w_proj"] + params["b_proj"]


if __name__ == "__main__":
    # Small, module-consistent shapes: window_size=4 -> N=16 tokens, dim=32, 4 heads.
    # B=16 windows: the wrapper picks TB=4 windows/step over a 4-step grid (so a
    # 2-TensorCore chip still gets >=2 pipelined steps per core).
    B = 16
    window_size = 4
    N = window_size * window_size
    dim = 32
    num_heads = 4

    key = jax.random.PRNGKey(0)
    k_x, k_tbl, k_wqkv, k_bqkv, k_wproj, k_bproj = jax.random.split(key, 6)

    x = jax.random.normal(k_x, (B, N, dim), dtype=jnp.float32)

    params = {
        # trunc_normal_(std=0.02) approximated deterministically with normal*0.02
        "rel_pos_bias_table": 0.02 * jax.random.normal(
            k_tbl, ((2 * window_size - 1) * (2 * window_size - 1), num_heads),
            dtype=jnp.float32),
        # Stored so that y = x @ w + b matches torch's y = x @ W.T + b
        "w_qkv": 0.1 * jax.random.normal(k_wqkv, (dim, 3 * dim), dtype=jnp.float32),
        "b_qkv": 0.1 * jax.random.normal(k_bqkv, (3 * dim,), dtype=jnp.float32),
        "w_proj": 0.1 * jax.random.normal(k_wproj, (dim, dim), dtype=jnp.float32),
        "b_proj": 0.1 * jax.random.normal(k_bproj, (dim,), dtype=jnp.float32),
    }

    prep = prepare_params(params, window_size=window_size, num_heads=num_heads)
    out = window_attention(x, prep, window_size=window_size, num_heads=num_heads)
    out = jax.block_until_ready(out)

    ref = _reference(x, params, window_size=window_size, num_heads=num_heads)
    assert out.shape == (B, N, dim)
    max_err = float(jnp.max(jnp.abs(out - ref)))
    # bf16 matmuls + approx reciprocal => relaxed tolerance vs the f32 reference.
    assert jnp.allclose(out, ref, atol=2e-2, rtol=2e-2), \
        f"mismatch vs reference (max abs err {max_err:.3e})"

    print("KERNEL_OK")
</pallas_src>

<mosaic_0001>
module attributes {stable_mosaic.version = 11 : i64} {
  func.func @_window_attention_kernel(%arg0: i32, %arg1: memref<4x16x32xbf16, #tpu.memory_space<vmem>>, %arg2: memref<32x96xbf16, #tpu.memory_space<vmem>>, %arg3: memref<1x96xf32, #tpu.memory_space<vmem>>, %arg4: memref<32x32xbf16, #tpu.memory_space<vmem>>, %arg5: memref<1x32xf32, #tpu.memory_space<vmem>>, %arg6: memref<4x16x16xf32, #tpu.memory_space<vmem>>, %arg7: memref<4x16x32xf32, #tpu.memory_space<vmem>>, %arg8: memref<64x32xbf16, #tpu.memory_space<vmem>>) attributes {dimension_semantics = [#tpu.dimension_semantics<parallel>], iteration_bounds = array<i64: 4>, scalar_prefetch = 0 : i64, scratch_operands = 1 : i64, tpu.core_type = #tpu.core_type<tc>, window_params = [{transform_indices = @transform_0, window_bounds = array<i64: 4, 16, 32>}, {pipeline_mode = #tpu.pipeline_mode<synchronous>, transform_indices = @transform_1, window_bounds = array<i64: 32, 96>}, {pipeline_mode = #tpu.pipeline_mode<synchronous>, transform_indices = @transform_2, window_bounds = array<i64: 1, 96>}, {pipeline_mode = #tpu.pipeline_mode<synchronous>, transform_indices = @transform_3, window_bounds = array<i64: 32, 32>}, {pipeline_mode = #tpu.pipeline_mode<synchronous>, transform_indices = @transform_4, window_bounds = array<i64: 1, 32>}, {pipeline_mode = #tpu.pipeline_mode<synchronous>, transform_indices = @transform_5, window_bounds = array<i64: 4, 16, 16>}, {transform_indices = @transform_6, window_bounds = array<i64: 4, 16, 32>}]} {
    %c0 = arith.constant 0 : index
    %c0_0 = arith.constant 0 : index
    %c0_1 = arith.constant 0 : index
    %0 = vector.load %arg1[%c0, %c0_0, %c0_1] : memref<4x16x32xbf16, #tpu.memory_space<vmem>>, vector<4x16x32xbf16>
    %1 = vector.shape_cast %0 : vector<4x16x32xbf16> to vector<64x32xbf16>
    %c0_2 = arith.constant 0 : index
    %c0_3 = arith.constant 0 : index
    %2 = vector.load %arg2[%c0_2, %c0_3] : memref<32x96xbf16, #tpu.memory_space<vmem>>, vector<32x96xbf16>
    %cst = arith.constant dense<0.000000e+00> : vector<64x96xf32>
    %3 = tpu.matmul %1, %2, %cst {dimension_numbers = #tpu.dot_dimension_numbers<[1], [0], [0], [1], [0, 0, 1, 1], [], []>} : vector<64x32xbf16>, vector<32x96xbf16>, vector<64x96xf32> -> vector<64x96xf32>
    %c0_4 = arith.constant 0 : index
    %c0_5 = arith.constant 0 : index
    %4 = vector.load %arg3[%c0_4, %c0_5] : memref<1x96xf32, #tpu.memory_space<vmem>>, vector<1x96xf32>
    %5 = vector.broadcast %4 : vector<1x96xf32> to vector<64x96xf32>
    %6 = arith.addf %3, %5 : vector<64x96xf32>
    %7 = arith.truncf %6 : vector<64x96xf32> to vector<64x96xbf16>
    %8 = vector.extract_strided_slice %7 {offsets = [0, 0], sizes = [64, 8], strides = [1, 1]} : vector<64x96xbf16> to vector<64x8xbf16>
    %9 = vector.shape_cast %8 : vector<64x8xbf16> to vector<4x16x8xbf16>
    %10 = vector.extract_strided_slice %7 {offsets = [0, 32], sizes = [64, 8], strides = [1, 1]} : vector<64x96xbf16> to vector<64x8xbf16>
    %11 = vector.shape_cast %10 : vector<64x8xbf16> to vector<4x16x8xbf16>
    %12 = vector.extract_strided_slice %7 {offsets = [0, 64], sizes = [64, 8], strides = [1, 1]} : vector<64x96xbf16> to vector<64x8xbf16>
    %13 = vector.shape_cast %12 : vector<64x8xbf16> to vector<4x16x8xbf16>
    "tpu.trace_start"() <{level = 10 : i32, message = "bnd,bmd->bnm"}> : () -> ()
    %cst_6 = arith.constant dense<0.000000e+00> : vector<4x16x16xf32>
    %14 = tpu.matmul %9, %11, %cst_6 {dimension_numbers = #tpu.dot_dimension_numbers<[2], [2], [1], [1], [0, 0, 0, 1, 1, 1], [0], [0]>} : vector<4x16x8xbf16>, vector<4x16x8xbf16>, vector<4x16x16xf32> -> vector<4x16x16xf32>
    "tpu.trace_stop"() : () -> ()
    %c0_7 = arith.constant 0 : index
    %c0_8 = arith.constant 0 : index
    %c0_9 = arith.constant 0 : index
    %15 = vector.load %arg6[%c0_7, %c0_8, %c0_9] : memref<4x16x16xf32, #tpu.memory_space<vmem>>, vector<1x16x16xf32>
    %16 = vector.shape_cast %15 : vector<1x16x16xf32> to vector<16x16xf32>
    %17 = vector.shape_cast %16 : vector<16x16xf32> to vector<1x16x16xf32>
    %18 = vector.broadcast %17 : vector<1x16x16xf32> to vector<4x16x16xf32>
    %19 = arith.addf %14, %18 : vector<4x16x16xf32>
    %cst_10 = arith.constant dense<0xFF800000> : vector<4x16xf32>
    %20 = vector.multi_reduction <maximumf>, %19, %cst_10 [2] : vector<4x16x16xf32> to vector<4x16xf32>
    %21 = vector.shape_cast %20 : vector<4x16xf32> to vector<4x16x1xf32>
    %22 = vector.broadcast %21 : vector<4x16x1xf32> to vector<4x16x16xf32>
    %23 = arith.subf %19, %22 : vector<4x16x16xf32>
    %24 = math.exp %23 : vector<4x16x16xf32>
    %cst_11 = arith.constant dense<0.000000e+00> : vector<4x16xf32>
    %25 = vector.multi_reduction <add>, %24, %cst_11 [2] : vector<4x16x16xf32> to vector<4x16xf32>
    %26 = vector.shape_cast %25 : vector<4x16xf32> to vector<4x16x1xf32>
    %27 = tpu.reciprocal %26 {approx = true} : vector<4x16x1xf32> -> vector<4x16x1xf32>
    %28 = vector.broadcast %27 : vector<4x16x1xf32> to vector<4x16x16xf32>
    %29 = arith.mulf %24, %28 : vector<4x16x16xf32>
    %30 = arith.truncf %29 : vector<4x16x16xf32> to vector<4x16x16xbf16>
    "tpu.trace_start"() <{level = 10 : i32, message = "bnm,bmd->bnd"}> : () -> ()
    %cst_12 = arith.constant dense<0.000000e+00> : vector<4x16x8xf32>
    %31 = tpu.matmul %30, %13, %cst_12 {dimension_numbers = #tpu.dot_dimension_numbers<[2], [1], [1], [2], [0, 0, 0, 1, 1, 2], [0], [0]>} : vector<4x16x16xbf16>, vector<4x16x8xbf16>, vector<4x16x8xf32> -> vector<4x16x8xf32>
    "tpu.trace_stop"() : () -> ()
    %32 = vector.shape_cast %31 : vector<4x16x8xf32> to vector<64x8xf32>
    %33 = arith.truncf %32 : vector<64x8xf32> to vector<64x8xbf16>
    %c0_13 = arith.constant 0 : index
    %c0_14 = arith.constant 0 : index
    %34 = vector.load %arg8[%c0_13, %c0_14] : memref<64x32xbf16, #tpu.memory_space<vmem>>, vector<64x8xbf16>
    tpu.vector_store %arg8[%c0_13, %c0_14], %33 {strides = array<i32>} : memref<64x32xbf16, #tpu.memory_space<vmem>>, vector<64x8xbf16>,
    %35 = vector.extract_strided_slice %7 {offsets = [0, 8], sizes = [64, 8], strides = [1, 1]} : vector<64x96xbf16> to vector<64x8xbf16>
    %36 = vector.shape_cast %35 : vector<64x8xbf16> to vector<4x16x8xbf16>
    %37 = vector.extract_strided_slice %7 {offsets = [0, 40], sizes = [64, 8], strides = [1, 1]} : vector<64x96xbf16> to vector<64x8xbf16>
    %38 = vector.shape_cast %37 : vector<64x8xbf16> to vector<4x16x8xbf16>
    %39 = vector.extract_strided_slice %7 {offsets = [0, 72], sizes = [64, 8], strides = [1, 1]} : vector<64x96xbf16> to vector<64x8xbf16>
    %40 = vector.shape_cast %39 : vector<64x8xbf16> to vector<4x16x8xbf16>
    "tpu.trace_start"() <{level = 10 : i32, message = "bnd,bmd->bnm"}> : () -> ()
    %cst_15 = arith.constant dense<0.000000e+00> : vector<4x16x16xf32>
    %41 = tpu.matmul %36, %38, %cst_15 {dimension_numbers = #tpu.dot_dimension_numbers<[2], [2], [1], [1], [0, 0, 0, 1, 1, 1], [0], [0]>} : vector<4x16x8xbf16>, vector<4x16x8xbf16>, vector<4x16x16xf32> -> vector<4x16x16xf32>
    "tpu.trace_stop"() : () -> ()
    %c1 = arith.constant 1 : index
    %c0_16 = arith.constant 0 : index
    %c0_17 = arith.constant 0 : index
    %42 = vector.load %arg6[%c1, %c0_16, %c0_17] : memref<4x16x16xf32, #tpu.memory_space<vmem>>, vector<1x16x16xf32>
    %43 = vector.shape_cast %42 : vector<1x16x16xf32> to vector<16x16xf32>
    %44 = vector.shape_cast %43 : vector<16x16xf32> to vector<1x16x16xf32>
    %45 = vector.broadcast %44 : vector<1x16x16xf32> to vector<4x16x16xf32>
    %46 = arith.addf %41, %45 : vector<4x16x16xf32>
    %cst_18 = arith.constant dense<0xFF800000> : vector<4x16xf32>
    %47 = vector.multi_reduction <maximumf>, %46, %cst_18 [2] : vector<4x16x16xf32> to vector<4x16xf32>
    %48 = vector.shape_cast %47 : vector<4x16xf32> to vector<4x16x1xf32>
    %49 = vector.broadcast %48 : vector<4x16x1xf32> to vector<4x16x16xf32>
    %50 = arith.subf %46, %49 : vector<4x16x16xf32>
    %51 = math.exp %50 : vector<4x16x16xf32>
    %cst_19 = arith.constant dense<0.000000e+00> : vector<4x16xf32>
    %52 = vector.multi_reduction <add>, %51, %cst_19 [2] : vector<4x16x16xf32> to vector<4x16xf32>
    %53 = vector.shape_cast %52 : vector<4x16xf32> to vector<4x16x1xf32>
    %54 = tpu.reciprocal %53 {approx = true} : vector<4x16x1xf32> -> vector<4x16x1xf32>
    %55 = vector.broadcast %54 : vector<4x16x1xf32> to vector<4x16x16xf32>
    %56 = arith.mulf %51, %55 : vector<4x16x16xf32>
    %57 = arith.truncf %56 : vector<4x16x16xf32> to vector<4x16x16xbf16>
    "tpu.trace_start"() <{level = 10 : i32, message = "bnm,bmd->bnd"}> : () -> ()
    %cst_20 = arith.constant dense<0.000000e+00> : vector<4x16x8xf32>
    %58 = tpu.matmul %57, %40, %cst_20 {dimension_numbers = #tpu.dot_dimension_numbers<[2], [1], [1], [2], [0, 0, 0, 1, 1, 2], [0], [0]>} : vector<4x16x16xbf16>, vector<4x16x8xbf16>, vector<4x16x8xf32> -> vector<4x16x8xf32>
    "tpu.trace_stop"() : () -> ()
    %59 = vector.shape_cast %58 : vector<4x16x8xf32> to vector<64x8xf32>
    %60 = arith.truncf %59 : vector<64x8xf32> to vector<64x8xbf16>
    %c0_21 = arith.constant 0 : index
    %c8 = arith.constant 8 : index
    %61 = vector.load %arg8[%c0_21, %c8] : memref<64x32xbf16, #tpu.memory_space<vmem>>, vector<64x8xbf16>
    tpu.vector_store %arg8[%c0_21, %c8], %60 {strides = array<i32>} : memref<64x32xbf16, #tpu.memory_space<vmem>>, vector<64x8xbf16>,
    %62 = vector.extract_strided_slice %7 {offsets = [0, 16], sizes = [64, 8], strides = [1, 1]} : vector<64x96xbf16> to vector<64x8xbf16>
    %63 = vector.shape_cast %62 : vector<64x8xbf16> to vector<4x16x8xbf16>
    %64 = vector.extract_strided_slice %7 {offsets = [0, 48], sizes = [64, 8], strides = [1, 1]} : vector<64x96xbf16> to vector<64x8xbf16>
    %65 = vector.shape_cast %64 : vector<64x8xbf16> to vector<4x16x8xbf16>
    %66 = vector.extract_strided_slice %7 {offsets = [0, 80], sizes = [64, 8], strides = [1, 1]} : vector<64x96xbf16> to vector<64x8xbf16>
    %67 = vector.shape_cast %66 : vector<64x8xbf16> to vector<4x16x8xbf16>
    "tpu.trace_start"() <{level = 10 : i32, message = "bnd,bmd->bnm"}> : () -> ()
    %cst_22 = arith.constant dense<0.000000e+00> : vector<4x16x16xf32>
    %68 = tpu.matmul %63, %65, %cst_22 {dimension_numbers = #tpu.dot_dimension_numbers<[2], [2], [1], [1], [0, 0, 0, 1, 1, 1], [0], [0]>} : vector<4x16x8xbf16>, vector<4x16x8xbf16>, vector<4x16x16xf32> -> vector<4x16x16xf32>
    "tpu.trace_stop"() : () -> ()
    %c2 = arith.constant 2 : index
    %c0_23 = arith.constant 0 : index
    %c0_24 = arith.constant 0 : index
    %69 = vector.load %arg6[%c2, %c0_23, %c0_24] : memref<4x16x16xf32, #tpu.memory_space<vmem>>, vector<1x16x16xf32>
    %70 = vector.shape_cast %69 : vector<1x16x16xf32> to vector<16x16xf32>
    %71 = vector.shape_cast %70 : vector<16x16xf32> to vector<1x16x16xf32>
    %72 = vector.broadcast %71 : vector<1x16x16xf32> to vector<4x16x16xf32>
    %73 = arith.addf %68, %72 : vector<4x16x16xf32>
    %cst_25 = arith.constant dense<0xFF800000> : vector<4x16xf32>
    %74 = vector.multi_reduction <maximumf>, %73, %cst_25 [2] : vector<4x16x16xf32> to vector<4x16xf32>
    %75 = vector.shape_cast %74 : vector<4x16xf32> to vector<4x16x1xf32>
    %76 = vector.broadcast %75 : vector<4x16x1xf32> to vector<4x16x16xf32>
    %77 = arith.subf %73, %76 : vector<4x16x16xf32>
    %78 = math.exp %77 : vector<4x16x16xf32>
    %cst_26 = arith.constant dense<0.000000e+00> : vector<4x16xf32>
    %79 = vector.multi_reduction <add>, %78, %cst_26 [2] : vector<4x16x16xf32> to vector<4x16xf32>
    %80 = vector.shape_cast %79 : vector<4x16xf32> to vector<4x16x1xf32>
    %81 = tpu.reciprocal %80 {approx = true} : vector<4x16x1xf32> -> vector<4x16x1xf32>
    %82 = vector.broadcast %81 : vector<4x16x1xf32> to vector<4x16x16xf32>
    %83 = arith.mulf %78, %82 : vector<4x16x16xf32>
    %84 = arith.truncf %83 : vector<4x16x16xf32> to vector<4x16x16xbf16>
    "tpu.trace_start"() <{level = 10 : i32, message = "bnm,bmd->bnd"}> : () -> ()
    %cst_27 = arith.constant dense<0.000000e+00> : vector<4x16x8xf32>
    %85 = tpu.matmul %84, %67, %cst_27 {dimension_numbers = #tpu.dot_dimension_numbers<[2], [1], [1], [2], [0, 0, 0, 1, 1, 2], [0], [0]>} : vector<4x16x16xbf16>, vector<4x16x8xbf16>, vector<4x16x8xf32> -> vector<4x16x8xf32>
    "tpu.trace_stop"() : () -> ()
    %86 = vector.shape_cast %85 : vector<4x16x8xf32> to vector<64x8xf32>
    %87 = arith.truncf %86 : vector<64x8xf32> to vector<64x8xbf16>
    %c0_28 = arith.constant 0 : index
    %c16 = arith.constant 16 : index
    %88 = vector.load %arg8[%c0_28, %c16] : memref<64x32xbf16, #tpu.memory_space<vmem>>, vector<64x8xbf16>
    tpu.vector_store %arg8[%c0_28, %c16], %87 {strides = array<i32>} : memref<64x32xbf16, #tpu.memory_space<vmem>>, vector<64x8xbf16>,
    %89 = vector.extract_strided_slice %7 {offsets = [0, 24], sizes = [64, 8], strides = [1, 1]} : vector<64x96xbf16> to vector<64x8xbf16>
    %90 = vector.shape_cast %89 : vector<64x8xbf16> to vector<4x16x8xbf16>
    %91 = vector.extract_strided_slice %7 {offsets = [0, 56], sizes = [64, 8], strides = [1, 1]} : vector<64x96xbf16> to vector<64x8xbf16>
    %92 = vector.shape_cast %91 : vector<64x8xbf16> to vector<4x16x8xbf16>
    %93 = vector.extract_strided_slice %7 {offsets = [0, 88], sizes = [64, 8], strides = [1, 1]} : vector<64x96xbf16> to vector<64x8xbf16>
    %94 = vector.shape_cast %93 : vector<64x8xbf16> to vector<4x16x8xbf16>
    "tpu.trace_start"() <{level = 10 : i32, message = "bnd,bmd->bnm"}> : () -> ()
    %cst_29 = arith.constant dense<0.000000e+00> : vector<4x16x16xf32>
    %95 = tpu.matmul %90, %92, %cst_29 {dimension_numbers = #tpu.dot_dimension_numbers<[2], [2], [1], [1], [0, 0, 0, 1, 1, 1], [0], [0]>} : vector<4x16x8xbf16>, vector<4x16x8xbf16>, vector<4x16x16xf32> -> vector<4x16x16xf32>
    "tpu.trace_stop"() : () -> ()
    %c3 = arith.constant 3 : index
    %c0_30 = arith.constant 0 : index
    %c0_31 = arith.constant 0 : index
    %96 = vector.load %arg6[%c3, %c0_30, %c0_31] : memref<4x16x16xf32, #tpu.memory_space<vmem>>, vector<1x16x16xf32>
    %97 = vector.shape_cast %96 : vector<1x16x16xf32> to vector<16x16xf32>
    %98 = vector.shape_cast %97 : vector<16x16xf32> to vector<1x16x16xf32>
    %99 = vector.broadcast %98 : vector<1x16x16xf32> to vector<4x16x16xf32>
    %100 = arith.addf %95, %99 : vector<4x16x16xf32>
    %cst_32 = arith.constant dense<0xFF800000> : vector<4x16xf32>
    %101 = vector.multi_reduction <maximumf>, %100, %cst_32 [2] : vector<4x16x16xf32> to vector<4x16xf32>
    %102 = vector.shape_cast %101 : vector<4x16xf32> to vector<4x16x1xf32>
    %103 = vector.broadcast %102 : vector<4x16x1xf32> to vector<4x16x16xf32>
    %104 = arith.subf %100, %103 : vector<4x16x16xf32>
    %105 = math.exp %104 : vector<4x16x16xf32>
    %cst_33 = arith.constant dense<0.000000e+00> : vector<4x16xf32>
    %106 = vector.multi_reduction <add>, %105, %cst_33 [2] : vector<4x16x16xf32> to vector<4x16xf32>
    %107 = vector.shape_cast %106 : vector<4x16xf32> to vector<4x16x1xf32>
    %108 = tpu.reciprocal %107 {approx = true} : vector<4x16x1xf32> -> vector<4x16x1xf32>
    %109 = vector.broadcast %108 : vector<4x16x1xf32> to vector<4x16x16xf32>
    %110 = arith.mulf %105, %109 : vector<4x16x16xf32>
    %111 = arith.truncf %110 : vector<4x16x16xf32> to vector<4x16x16xbf16>
    "tpu.trace_start"() <{level = 10 : i32, message = "bnm,bmd->bnd"}> : () -> ()
    %cst_34 = arith.constant dense<0.000000e+00> : vector<4x16x8xf32>
    %112 = tpu.matmul %111, %94, %cst_34 {dimension_numbers = #tpu.dot_dimension_numbers<[2], [1], [1], [2], [0, 0, 0, 1, 1, 2], [0], [0]>} : vector<4x16x16xbf16>, vector<4x16x8xbf16>, vector<4x16x8xf32> -> vector<4x16x8xf32>
    "tpu.trace_stop"() : () -> ()
    %113 = vector.shape_cast %112 : vector<4x16x8xf32> to vector<64x8xf32>
    %114 = arith.truncf %113 : vector<64x8xf32> to vector<64x8xbf16>
    %c0_35 = arith.constant 0 : index
    %c24 = arith.constant 24 : index
    %115 = vector.load %arg8[%c0_35, %c24] : memref<64x32xbf16, #tpu.memory_space<vmem>>, vector<64x8xbf16>
    tpu.vector_store %arg8[%c0_35, %c24], %114 {strides = array<i32>} : memref<64x32xbf16, #tpu.memory_space<vmem>>, vector<64x8xbf16>,
    %c0_36 = arith.constant 0 : index
    %c0_37 = arith.constant 0 : index
    %116 = vector.load %arg8[%c0_36, %c0_37] : memref<64x32xbf16, #tpu.memory_space<vmem>>, vector<64x32xbf16>
    %c0_38 = arith.constant 0 : index
    %c0_39 = arith.constant 0 : index
    %117 = vector.load %arg4[%c0_38, %c0_39] : memref<32x32xbf16, #tpu.memory_space<vmem>>, vector<32x32xbf16>
    %cst_40 = arith.constant dense<0.000000e+00> : vector<64x32xf32>
    %118 = tpu.matmul %116, %117, %cst_40 {dimension_numbers = #tpu.dot_dimension_numbers<[1], [0], [0], [1], [0, 0, 1, 1], [], []>} : vector<64x32xbf16>, vector<32x32xbf16>, vector<64x32xf32> -> vector<64x32xf32>
    %c0_41 = arith.constant 0 : index
    %c0_42 = arith.constant 0 : index
    %119 = vector.load %arg5[%c0_41, %c0_42] : memref<1x32xf32, #tpu.memory_space<vmem>>, vector<1x32xf32>
    %120 = vector.broadcast %119 : vector<1x32xf32> to vector<64x32xf32>
    %121 = arith.addf %118, %120 : vector<64x32xf32>
    %122 = vector.shape_cast %121 : vector<64x32xf32> to vector<4x16x32xf32>
    %c0_43 = arith.constant 0 : index
    %c0_44 = arith.constant 0 : index
    %c0_45 = arith.constant 0 : index
    %123 = vector.load %arg7[%c0_43, %c0_44, %c0_45] : memref<4x16x32xf32, #tpu.memory_space<vmem>>, vector<4x16x32xf32>
    tpu.vector_store %arg7[%c0_43, %c0_44, %c0_45], %122 {strides = array<i32>} : memref<4x16x32xf32, #tpu.memory_space<vmem>>, vector<4x16x32xf32>,
    return
  }
  func.func @transform_0(%arg0: i32) -> (i32, i32, i32) {
    %c0_i32 = arith.constant 0 : i32
    %c0_i32_0 = arith.constant 0 : i32
    %c0_i32_1 = arith.constant 0 : i32
    return %arg0, %c0_i32, %c0_i32_0 : i32, i32, i32
  }
  func.func @transform_1(%arg0: i32) -> (i32, i32) {
    %c0_i32 = arith.constant 0 : i32
    %c0_i32_0 = arith.constant 0 : i32
    %c0_i32_1 = arith.constant 0 : i32
    return %c0_i32, %c0_i32_0 : i32, i32
  }
  func.func @transform_2(%arg0: i32) -> (i32, i32) {
    %c0_i32 = arith.constant 0 : i32
    %c0_i32_0 = arith.constant 0 : i32
    %c0_i32_1 = arith.constant 0 : i32
    return %c0_i32, %c0_i32_0 : i32, i32
  }
  func.func @transform_3(%arg0: i32) -> (i32, i32) {
    %c0_i32 = arith.constant 0 : i32
    %c0_i32_0 = arith.constant 0 : i32
    %c0_i32_1 = arith.constant 0 : i32
    return %c0_i32, %c0_i32_0 : i32, i32
  }
  func.func @transform_4(%arg0: i32) -> (i32, i32) {
    %c0_i32 = arith.constant 0 : i32
    %c0_i32_0 = arith.constant 0 : i32
    %c0_i32_1 = arith.constant 0 : i32
    return %c0_i32, %c0_i32_0 : i32, i32
  }
  func.func @transform_5(%arg0: i32) -> (i32, i32, i32) {
    %c0_i32 = arith.constant 0 : i32
    %c0_i32_0 = arith.constant 0 : i32
    %c0_i32_1 = arith.constant 0 : i32
    %c0_i32_2 = arith.constant 0 : i32
    return %c0_i32, %c0_i32_0, %c0_i32_1 : i32, i32, i32
  }
  func.func @transform_6(%arg0: i32) -> (i32, i32, i32) {
    %c0_i32 = arith.constant 0 : i32
    %c0_i32_0 = arith.constant 0 : i32
    %c0_i32_1 = arith.constant 0 : i32
    return %arg0, %c0_i32, %c0_i32_0 : i32, i32, i32
  }
}

</mosaic_0001>

<bundles_post_ra>
// kernel: tpu_custom_call.1
= control target key start
LH: loop header
LB: loop body
LE: loop exit
PB: predicated region body
PF: predicated region fallthrough
CT: control target
= control target key end

     0   :  { %11 = vsyncpa [#allocation4], 0  ;;  %s4467_s0 = inlined_call_operand.hbm [shape: bf16[16,16,32], index: 0, kind: input, shape index: {}]   ;;  %s4468_s1 = inlined_call_operand.hbm [shape: bf16[32,96], index: 1, kind: input, shape index: {}]   ;;  %s4469_s2 = inlined_call_operand.vmem [shape: f32[1,96], index: 2, kind: input, shape index: {}]   ;;  %s4470_s3 = inlined_call_operand.hbm [shape: bf16[32,32], index: 3, kind: input, shape index: {}]   ;;  %s4471_s4 = inlined_call_operand.vmem [shape: f32[1,32], index: 4, kind: input, shape index: {}]   ;;  %s4472_s5 = inlined_call_operand.hbm [shape: f32[4,16,16], index: 5, kind: input, shape index: {}]   ;;  %s4473_s6 = inlined_call_operand.hbm [shape: f32[16,16,32], index: 6, kind: output, shape index: {}]  }
   0x1   :  { %13 = vsyncpa [#allocation4 + $0x1], 0 }
   0x2   :  { %14 = vsyncpa [#allocation7], 0 }
   0x3   :  { %15 = vsyncpa [#allocation10], 0 }
   0x4   :  { %16 = vsyncpa [#allocation5], 0 }
   0x5   :  { %18 = vsyncpa [#allocation5 + $0x1], 0  ;;  %s3780_s21 = smov 0   ;;  %s3782_s22 = smov 0  }
   0x6   :  { %s3784_s23 = smov 0   ;;  %s3786_s24 = smov 0  }
   0x7 LB: > { %s3801_s25 = sadd.s32 4294967295, %s3717_s24   ;;  %s2861_s26 = sadd.s32 4294967294, %s3717_s24   ;;  %s3717_s24 = sphi %s3786_s24, %s4499_s24   ;;  %s3713_s23 = sphi %s3784_s23, %s4498_s23   ;;  %s3709_s22 = sphi %s3782_s22, %s4497_s22   ;;  %s3705_s21 = sphi %s3780_s21, %s4496_s21  }
   0x8   : > { %p44_p0 = scmp.ne.s32.totalorder %s3709_s22, %s3705_s21  ;;  %p4474_p1 = scmp.eq.s32.totalorder %s3801_s25, 0 }
   0x9   : > { %p173_p2 = scmp.eq.s32.totalorder %s3801_s25, 3  ;;  %p179_p3 = scmp.eq.s32.totalorder %s2861_s26, 3 }
   0xa   : > { %p3810_p4 = por %p4474_p1, %p44_p0  ;;  %p2862_p5 = scmp.ge.s32.totalorder %s3717_s24, 1 }
   0xb   : > { %p3815_p6 = por %p179_p3, %p44_p0  ;;  %p186_p7 = scmp.lt.s32.totalorder %s3717_s24, 5 }
   0xc   : > { %s4480_s27 = scalar_select %p3810_p4, 1, 0 }
   0xd   : > { %s4481_s28 = scalar_select %p3815_p6, 1, 0 }
   0xe   : > { %p3820_p8 = pnand %p2862_p5, %p186_p7  ;;  %s3719_s30 = smov [#allocation6]  }
   0xf   : > { %s198_s7 = sshll.u32 %s3719_s30, 4  ;;  %s3720_s9 = smov [#allocation8]   ;;  %s199_s7 = int_to_ptr.vmem [resolvable:$true] %s198_s7 }
  0x10   : > { %s4482_s29 = scalar_select %p3820_p8, 1, 0 }
  0x11   : > { %p3317_p9 = pneg %p3820_p8  ;;  %s214_s10 = sshll.u32 %s3720_s9, 4  ;;  %s215_s10 = int_to_ptr.vmem [resolvable:$true] %s214_s10 }
  0x12   : > { %s3721_s11 = smov [#allocation9]   ;;  %s3550_s13 = scalar_lea.vmem %s199_s7, 256 }
  0x13   : > { %p3828_p10 = pnand %p3317_p9, %p4474_p1  ;;  %s230_s12 = sshll.u32 %s3721_s11, 4  ;;  %s231_s12 = int_to_ptr.vmem [resolvable:$true] %s230_s12 }
  0x14   : > { %p3551_p12 = scmp.ne.s32.totalorder %s199_s7, %s3550_s13  ;;  %p3558_p3 = scmp.lt.s32.totalorder %s199_s7, %s199_s7 }
  0x15   : > { %p3541_p11 = pneg %p3828_p10  ;;  %p3559_p5 = scmp.lt.s32.totalorder %s3550_s13, %s3550_s13 }
  0x17   : > { %p3553_p13 = pnand %p3551_p12, %p3541_p11  ;;  %p3560_p7 = por %p3559_p5, %p3558_p3 }
  0x19   : > { %p3554_p0 = pneg %p3553_p13 }
  0x1b   : > { %p3561_p9 = pnand %p3560_p7, %p3554_p0 }
  0x1d   : > { %3564 = shalt.err (!%p3561_p9)
}
  0x1e   : > { %s4475_s14 = smov 64   ;;  %s4476_s15 = smov 4  }
  0x1f   : > { %3320 = dma.hbm_to_vmem [thread:$0]  (!%p3828_p10), %s4468_s1, 256, %s199_s7, [#allocation7], %s4475_s14, %s4475_s14, %s4476_s15  }
  0x20   : > { %s3576_s18 = scalar_lea.vmem %s215_s10, 256  ;;  %p3584_p0 = scmp.lt.s32.totalorder %s215_s10, %s215_s10 }
  0x21   : > { %p3577_p12 = scmp.ne.s32.totalorder %s215_s10, %s3576_s18  ;;  %p3585_p5 = scmp.lt.s32.totalorder %s3576_s18, %s3576_s18 }
  0x23   : > { %p3579_p13 = pnand %p3577_p12, %p3541_p11  ;;  %p3586_p7 = por %p3585_p5, %p3584_p0 }
  0x25   : > { %p3580_p3 = pneg %p3579_p13 }
  0x27   : > { %p3587_p9 = pnand %p3586_p7, %p3580_p3 }
  0x29   : > { %3590 = shalt.err (!%p3587_p9)
}
  0x2a   : > { %3323 = dma.hbm_to_vmem [thread:$0]  (!%p3828_p10), %s4470_s3, 256, %s215_s10, [#allocation7], %s4475_s14, %s4475_s14, %s4476_s15  }
  0x2b   : > { %s3602_s26 = scalar_lea.vmem %s231_s12, 1024  ;;  %p3610_p0 = scmp.lt.s32.totalorder %s231_s12, %s231_s12 }
  0x2c   : > { %p3603_p1 = scmp.ne.s32.totalorder %s231_s12, %s3602_s26  ;;  %p3611_p3 = scmp.lt.s32.totalorder %s3602_s26, %s3602_s26 }
  0x2e   : > { %p3605_p12 = pnand %p3603_p1, %p3541_p11  ;;  %p3612_p5 = por %p3611_p3, %p3610_p0 }
  0x30   : > { %p3606_p13 = pneg %p3605_p12 }
  0x32   : > { %p3613_p7 = pnand %p3612_p5, %p3606_p13 }
  0x34   : > { %3616 = shalt.err (!%p3613_p7)
}
  0x35   : > { %s3724_s30 = smov 128   ;;  %s3725_s7 = smov 8  }
  0x36   : > { %3326 = dma.hbm_to_vmem [thread:$0]  (!%p3828_p10), %s4472_s5, 1024, %s231_s12, [#allocation10], %s3724_s30, %s3724_s30, %s3725_s7  }
  0x37   : > { %s3865_s11 = sadd.s32 1, %s3717_s24   ;;  %s31_s16 = sadd.s32 1, %s3713_s23 }
  0x38   : > { %s28_s13 = ssub.s32 %s3717_s24, %s3865_s11  ;;  %p38_p11 = scmp.ne.s32.totalorder %s3713_s23, %s3709_s22 }
  0x39   : > { %p29_p1 = scmp.eq.s32.totalorder %s28_s13, 0  ;;  %p39_p9 = scmp.eq.s32.totalorder %s3717_s24, 0 }
  0x3a   : > { %p3338_p12 = scmp.lt.s32.totalorder %s3717_s24, 4  ;;  %p3879_p0 = por %p173_p2, %p38_p11 }
  0x3b   : > { %s3875_s17 = scalar_select %p29_p1, %s3713_s23, %s31_s16  }
  0x3c   : > { %p40_p13 = por %p39_p9, %p38_p11  ;;  %s244_s8 = sand.u32 1, %s3713_s23  }
  0x3d   : > { %s4484_s18 = scalar_select %p3879_p0, 1, 0 }
  0x3e   : > { %s2970_s19 = sshll.u32 %s3717_s24, 9  ;;  %s2867_s12 = sshll.u32 %s244_s8, 5 }
  0x3f   : > { %s3888_s30 = scalar_lea.hbm %s4467_s0, %s2970_s19  ;;  %s248_s7 = scalar_lea.vmem [#allocation3], %s2867_s12 }
  0x40   : > { %s256_s9 = sshll.u32 %s248_s7, 4  ;;  %p3890_p10 = pnand %p3338_p12, %p40_p13  ;;  %s3894_s9 = int_to_ptr.vmem [resolvable:$true] %s256_s9 }
  0x41   : > { %s3896_s13 = scalar_lea.sflag [#allocation4], %s244_s8  ;;  %s3617_s16 = scalar_lea.hbm %s3888_s30, 512 }
  0x42   : > { %p3618_p2 = scmp.ne.s32.totalorder %s3888_s30, %s3617_s16  ;;  %p3619_p3 = pneg %p3890_p10 }
  0x43   : > { %s3622_s12 = scalar_lea.hbm %s4467_s0, 2048  ;;  %p3623_p1 = scmp.lt.s32.totalorder %s3888_s30, %s4467_s0 }
  0x44   : > { %p3620_p5 = pnand %p3619_p3, %p3618_p2  ;;  %p3624_p11 = scmp.lt.s32.totalorder %s3622_s12, %s3617_s16 }
  0x46   : > { %p3621_p7 = pneg %p3620_p5  ;;  %p3625_p9 = por %p3624_p11, %p3623_p1 }
  0x48   : > { %p3626_p12 = pnand %p3625_p9, %p3621_p7 }
  0x4a   : > { %3629 = shalt.err (!%p3626_p12)
}
  0x4b   : > { %s3630_s8 = scalar_lea.vmem %s3894_s9, 512  ;;  %s3726_s14 = smov [#allocation3]  }
  0x4c   : > { %p3631_p13 = scmp.ne.s32.totalorder %s3894_s9, %s3630_s8  ;;  %s3635_s15 = sshll.u32 %s3726_s14, 4  ;;  %s3636_s15 = int_to_ptr.vmem [resolvable:$false] %s3635_s15 }
  0x4d   : > { %s3637_s19 = scalar_lea.vmem %s3636_s15, 1024  ;;  %p3638_p5 = scmp.lt.s32.totalorder %s3894_s9, %s3636_s15 }
  0x4e   : > { %p3633_p6 = pnand %p3631_p13, %p3619_p3  ;;  %p3639_p0 = scmp.lt.s32.totalorder %s3637_s19, %s3630_s8 }
  0x50   : > { %p3634_p2 = pneg %p3633_p6  ;;  %p3640_p4 = por %p3639_p0, %p3638_p5 }
  0x52   : > { %p3641_p8 = pnand %p3640_p4, %p3634_p2 }
  0x54   : > { %3644 = shalt.err (!%p3641_p8)
}
  0x55   : > { %s4486_s16 = smov 4   ;;  %s4487_s20 = smov 64  }
  0x56   : > { %3330 = dma.hbm_to_vmem [thread:$0]  (!%p3890_p10), %s3888_s30, 512, %s3894_s9, %s3896_s13, %s4487_s20, %s4487_s20, %s4486_s16  }
  0x57   : > { %p4488_p6 = scmp.ne.s32.totalorder %s4482_s29, 0 }
  0x58   : > { %s3923_s14 = sand.u32 (!%p4488_p6), 1, %s3709_s22   ;;  %p4489_p4 = scmp.ne.s32.totalorder (!%p4488_p6), %s4480_s27, 0 }
  0x59   : > { %268 = sbr.rel (%p4488_p6) target bundleno = 3146 (0xc4a), region = 44  ;;  %s2872_s15 = sshll.u32 (!%p4488_p6), %s3923_s14, 5 }
  0x5a   : > { %s271_s12 = scalar_lea.sflag (!%p4488_p6), [#allocation4], %s3923_s14  ;;  %s274_s26 = scalar_lea.vmem (!%p4488_p6), [#allocation3], %s2872_s15 }
  0x5e   : > { %3688 = dma.done.wait (%p4489_p4), %s271_s12, 512  }
  0x5f   : > { %3690 = vsyncadd (%p4489_p4), %s271_s12, 4294966784  ;;  %p4490_p8 = scmp.eq.s32.totalorder %s3801_s25, 0 }
  0x61   : > { %3692 = dma.done.wait (%p4490_p8), [#allocation7], 512   ;;  %p4491_p0 = pmov %p4490_p8 }
  0x63   : > { %3694 = vsyncadd (%p4491_p0), [#allocation7], 4294966784  ;;  %p4492_p10 = pmov %p4491_p0 }
  0x64   : > { %p4493_p3 = pmov %p4491_p0 }
  0x65   : > { %3696 = dma.done.wait (%p4492_p10), [#allocation10], 1024  }
  0x66   : > { %3698 = vsyncadd (%p4493_p3), [#allocation10], 4294966272  ;;  %v3399_v0 = vld [vmem:[#allocation6 + $0x8] sm:$0xff]   ;;  %v3400_v1 = vld [vmem:[#allocation6] sm:$0xff]   ;;  %vm369_vm0 = vcmask 261120   ;;  %v3727_v6 = vmov 0.0  }
  0x67   : > { %3081 = vmatprep.subr.bf16.mxu0 %v3399_v0  ;;  %3297 = vmatprep.subr.bf16.mxu1 %v3399_v0  ;;  %v3401_v2 = vld [vmem:[%s274_s26] sm:$0xff]   ;;  %v3402_v3 = vld [vmem:[%s274_s26 + $0x10] sm:$0xff]   ;;  %v3403_v4 = vld [vmem:[%s274_s26 + $0x8] sm:$0xff]   ;;  %vm3728_vm1 = vmmov 0   ;;  %s3729_s30 = smov 96   ;;  %vm456_vm2 = vcmask 64512  }
  0x68   : > { %3082 = vmatpush3.bf16.msra.mxu0 %v3399_v0  ;;  %3299 = vmatpush3.bf16.msra.mxu1 %v3399_v0  ;;  %v3404_v5 = vld [vmem:[%s274_s26 + $0x18] sm:$0xff]   ;;  %v2877_v11 = vld [vmem:[%s4469_s2] ss:$0 sm:$0xff]  ;;  %vm654_vm3 = vcmask 130048   ;;  %v452_v43 = vld [vmem:[#allocation9 + $0x8] sm:$0xff]  ;;  %s3730_s9 = smov 64  }
  0x69   : > { %3083 = vmatprep.subr.bf16.mxu0 %v3400_v1  ;;  %3298 = vmatprep.subr.bf16.mxu1 %v3400_v1  ;;  %v451_v36 = vld [vmem:[#allocation9] sm:$0xff]  ;;  %s3731_s10 = smov 88   ;;  %s3732_s13 = smov 120   ;;  %vm967_vm4 = vcmask 60416   ;;  %vm1511_vm5 = vcmask 126016   ;;  %vm2055_vm6 = vcmask 191616  }
  0x6a   : > { %3085 = vmatprep.mubr.msk.bf16.mxu0 %vm369_vm0, %v3401_v2  ;;  %3089 = vmatprep.mubr.msk.bf16.mxu1 %vm369_vm0, %v3402_v3  ;;  %s3733_s7 = smov 56   ;;  %s3734_s8 = smov 80   ;;  %vm2599_vm7 = vcmask 257216  }
  0x6b   : > { %s3735_s19 = smov 112   ;;  %s3736_s16 = smov 48  }
  0x6c   : > { %3084 = vmatpush3.bf16.msra.mxu0 %v3400_v1  ;;  %3300 = vmatpush3.bf16.msra.mxu1 %v3400_v1  ;;  %s3737_s20 = smov 72   ;;  %s3738_s15 = smov 104  }
  0x6d   : > { %3093 = vmatprep.subr.bf16.mxu1 %v3727_v6  ;;  %3105 = vmatprep.subr.bf16.mxu0 %v3727_v6  ;;  %s3739_s12 = smov 40   ;;  %s3740_s26 = smov 8  }
  0x6e   : > { %s3741_s27 = smov 16   ;;  %s3742_s29 = smov 24  }
  0x6f   : > { %3086 = vmatmul.mubr.msk.bf16.vlgmr.msra.gmra.mxu0 %vm369_vm0, %v3403_v4  ;;  %3090 = vmatmul.mubr.msk.bf16.vlgmr.msra.gmra.mxu1 %vm369_vm0, %v3404_v5  ;;  %p4494_p1 = scmp.ne.s32.totalorder %s4484_s18, 0 }
  0x70   : > { %3095 = vmatprep.mubr.msk.bf16.mxu1 %vm3728_vm1, %v3727_v6  ;;  %3107 = vmatprep.mubr.msk.bf16.mxu0 %vm3728_vm1, %v3727_v6 }
 0x12f   : > { %v3087_v7 = vpop.f32.mrf.mxu0  ;;  %v3091_v8 = vpop.f32.mrf.mxu1 }
 0x130   : > { %v441_v20 = vadd.f32 %v3091_v8, %v2877_v11  ;;  %v425_v25 = vadd.f32 %v3087_v7, %v2877_v11 }
 0x131   : > { %v416_v9 = vpop.f32.mrf.mxu0  ;;  %v432_v10 = vpop.f32.mrf.mxu1 }
 0x132   : > { %v433_v14 = vadd.f32 %v2877_v11, %v432_v10  ;;  %v417_v17 = vadd.f32 %v2877_v11, %v416_v9 }
 0x133   : > { %v3088_v12 = vpop.f32.mrf.mxu0  ;;  %v3092_v13 = vpop.f32.mrf.mxu1 }
 0x134   : > { %v428_v21 = vadd.f32 %v3088_v12, %v2877_v11  ;;  %v444_v22 = vadd.f32 %v3092_v13, %v2877_v11 }
 0x135   : > { %v419_v15 = vpop.f32.mrf.mxu0  ;;  %v435_v16 = vpop.f32.mrf.mxu1 }
 0x136   : > { %v420_v18 = vadd.f32 %v2877_v11, %v419_v15  ;;  %v436_v19 = vadd.f32 %v2877_v11, %v435_v16  ;;  %v3958_v26 = vpack.c.bf16 %v428_v21, %v425_v25  ;;  %v3960_v27 = vpack.c.bf16 %v444_v22, %v441_v20 }
 0x138   : > { %v3952_v23 = vpack.c.bf16 %v420_v18, %v417_v17  ;;  %v3954_v24 = vpack.c.bf16 %v436_v19, %v433_v14 }
 0x13a   : > { %555 = vrot.lane.b32.xlu1 %v3954_v24, %s3729_s30  ;;  %454 = vrot.lane.b32.xlu0 %v3952_v23, %s3729_s30 }
 0x13e   : > { %605 = vrot.lane.b32.xlu1 %v3960_v27, %s3729_s30  ;;  %505 = vrot.lane.b32.xlu0 %v3958_v26, %s3729_s30  ;;  %s2876_s30 = sshll.u32 %s3923_s14, 6 }
 0x1ac   : > { %v556_v28 = vpop.permute.xlu1 %555  ;;  %v455_v29 = vpop.permute.xlu0 %454 }
 0x1ad   : > { %v561_v30 = vsel %vm456_vm2, %v556_v28, 0  ;;  %v461_v31 = vsel %vm456_vm2, %v455_v29, 0 }
 0x1ae   : > { %3094 = vmatpush3.bf16.xpose.msra.mxu1 %v461_v31  ;;  %3106 = vmatpush3.bf16.xpose.msra.mxu0 %v561_v30 }
 0x1af   : > { %3099 = vmatprep.subr.bf16.mxu1 %v3727_v6  ;;  %3117 = vmatprep.subr.bf16.mxu0 %v3727_v6 }
 0x1b0   : > { %v506_v32 = vpop.permute.xlu0 %505  ;;  %v606_v34 = vpop.permute.xlu1 %605 }
 0x1b1   : > { %v511_v33 = vsel %vm456_vm2, %v506_v32, 0  ;;  %v611_v35 = vsel %vm456_vm2, %v606_v34, 0 }
 0x1b5   : > { %3096 = vmatmul.mubr.msk.bf16.vlgmr.msra.gmra.mxu1 %vm456_vm2, %v3952_v23  ;;  %3108 = vmatmul.mubr.msk.bf16.vlgmr.msra.gmra.mxu0 %vm456_vm2, %v3954_v24 }
 0x1b6   : > { %3100 = vmatpush3.bf16.xpose.msra.mxu1 %v511_v33  ;;  %3101 = vmatprep.mubr.msk.bf16.mxu1 %vm3728_vm1, %v3727_v6 }
 0x1b7   : > { %3111 = vmatprep.subr.bf16.mxu1 %v3727_v6  ;;  %3119 = vmatprep.mubr.msk.bf16.mxu0 %vm3728_vm1, %v3727_v6 }
 0x1bd   : > { %3102 = vmatmul.mubr.msk.bf16.vlgmr.msra.gmra.mxu1 %vm456_vm2, %v3958_v26 }
 0x1be   : > { %3112 = vmatpush3.bf16.xpose.msra.mxu1 %v611_v35  ;;  %3113 = vmatprep.mubr.msk.bf16.mxu1 %vm3728_vm1, %v3727_v6 }
 0x1bf   : > { %3123 = vmatprep.subr.bf16.mxu1 %v3727_v6 }
 0x1c5   : > { %3114 = vmatmul.mubr.msk.bf16.vlgmr.msra.gmra.mxu1 %vm456_vm2, %v3960_v27 }
 0x1c6   : > { %3125 = vmatprep.mubr.msk.bf16.mxu1 %vm3728_vm1, %v3727_v6 }
 0x275   : > { %v497_v37 = vpop.f32.mrf.mxu1  ;;  %v597_v38 = vpop.f32.mrf.mxu0 }
 0x276   : > { %v498_v39 = vadd.f32 %v497_v37, %v451_v36  ;;  %v598_v40 = vadd.f32 %v597_v38, %v451_v36 }
 0x277   : > { %v3097_v41 = vpop.f32.mrf.mxu1  ;;  %v3109_v42 = vpop.f32.mrf.mxu0 }
 0x278   : > { %v667_v44 = vsel %vm654_vm3, %v598_v40, -inf  ;;  %v655_v45 = vsel %vm654_vm3, %v498_v39, -inf }
 0x279   : > { %668 = vmax.xlane.f32.xlu1 %v667_v44  ;;  %v600_v46 = vpop.f32.mrf.mxu0  ;;  %656 = vmax.xlane.f32.xlu0 %v655_v45  ;;  %v500_v47 = vpop.f32.mrf.mxu1 }
 0x27a   : > { %v501_v48 = vadd.f32 %v500_v47, %v452_v43  ;;  %v601_v59 = vadd.f32 %v600_v46, %v452_v43 }
 0x27b   : > { %v3098_v49 = vpop.f32.mrf.mxu1  ;;  %v3110_v50 = vpop.f32.mrf.mxu0 }
 0x27c   : > { %v658_v51 = vsel %vm654_vm3, %v501_v48, -inf  ;;  %v670_v0 = vsel %vm654_vm3, %v601_v59, -inf }
 0x27d   : > { %659 = vmax.xlane.f32.xlu1 %v658_v51  ;;  %v547_v52 = vpop.f32.mrf.mxu1 }
 0x27e   : > { %v548_v53 = vadd.f32 %v547_v52, %v451_v36 }
 0x27f   : > { %v3103_v54 = vpop.f32.mrf.mxu1 }
 0x280   : > { %v661_v55 = vsel %vm654_vm3, %v548_v53, -inf }
 0x281   : > { %662 = vmax.xlane.f32.xlu0 %v661_v55  ;;  %v550_v56 = vpop.f32.mrf.mxu1 }
 0x282   : > { %v551_v57 = vadd.f32 %v550_v56, %v452_v43 }
 0x283   : > { %v3104_v58 = vpop.f32.mrf.mxu1 }
 0x284   : > { %v664_v60 = vsel %vm654_vm3, %v551_v57, -inf }
 0x285   : > { %665 = vmax.xlane.f32.xlu0 %v664_v60  ;;  %v647_v61 = vpop.f32.mrf.mxu1 }
 0x286   : > { %v3993_v62 = vadd.f32 %v647_v61, %v451_v36 }
 0x287   : > { %v3115_v63 = vpop.f32.mrf.mxu1 }
 0x288   : > { %v673_v1 = vsel %vm654_vm3, %v3993_v62, -inf }
 0x289   : > { %671 = vmax.xlane.f32.xlu0 %v670_v0  ;;  %674 = vmax.xlane.f32.xlu1 %v673_v1  ;;  %v650_v2 = vpop.f32.mrf.mxu1 }
 0x28a   : > { %v651_v3 = vadd.f32 %v650_v2, %v452_v43 }
 0x28b   : > { %v3116_v4 = vpop.f32.mrf.mxu1 }
 0x28c   : > { %v676_v5 = vsel %vm654_vm3, %v651_v3, -inf }
 0x28d   : > { %677 = vmax.xlane.f32.xlu0 %v676_v5 }
 0x29a   : > { %747 = vrot.lane.b32.xlu1 %v3952_v23, %s3730_s9 }
 0x302   : > { %v669_v7 = vpop.xlane.xlu1 %668  ;;  %v657_v8 = vpop.xlane.xlu0 %656 }
 0x303   : > { %v683_v9 = vsub.f32 %v598_v40, %v669_v7  ;;  %v679_v10 = vsub.f32 %v498_v39, %v657_v8 }
 0x305   : > { %v687_v11 = vmul.f32 1.442695, %v679_v10  ;;  %v695_v12 = vmul.f32 1.442695, %v683_v9 }
 0x306   : > { %v660_v13 = vpop.xlane.xlu1 %659 }
 0x307   : > { %v680_v14 = vsub.f32 %v501_v48, %v660_v13  ;;  %3411 = vpow2.f32 %v687_v11 }
 0x308   : > { %3413 = vpow2.f32 %v695_v12 }
 0x309   : > { %v689_v15 = vmul.f32 1.442695, %v680_v14 }
 0x30a   : > { %v663_v16 = vpop.xlane.xlu0 %662 }
 0x30b   : > { %3415 = vpow2.f32 %v689_v15  ;;  %v681_v17 = vsub.f32 %v548_v53, %v663_v16 }
 0x30d   : > { %v691_v18 = vmul.f32 1.442695, %v681_v17 }
 0x30e   : > { %v666_v19 = vpop.xlane.xlu0 %665 }
 0x30f   : > { %3417 = vpow2.f32 %v691_v18  ;;  %v682_v20 = vsub.f32 %v551_v57, %v666_v19 }
 0x311   : > { %v693_v30 = vmul.f32 1.442695, %v682_v20 }
 0x312   : > { %v675_v21 = vpop.xlane.xlu1 %674  ;;  %v672_v22 = vpop.xlane.xlu0 %671 }
 0x313   : > { %v684_v25 = vsub.f32 %v601_v59, %v672_v22  ;;  %v685_v43 = vsub.f32 %v3993_v62, %v675_v21 }
 0x314   : > { %v3412_v28 = vpop.eup %3411 }
 0x315   : > { %v697_v29 = vmul.f32 1.442695, %v684_v25  ;;  %v703_v32 = vsel %vm654_vm3, %v3412_v28, 0.0  ;;  %v4002_v33 = vpop.eup %3413  ;;  %v699_v44 = vmul.f32 1.442695, %v685_v43 }
 0x316   : > { %v748_v31 = vpop.permute.xlu1 %747  ;;  %704 = vadd.xlane.f32.xlu1 %v703_v32  ;;  %v715_v36 = vsel %vm654_vm3, %v4002_v33, 0.0  ;;  %v678_v45 = vpop.xlane.xlu0 %677 }
 0x317   : > { %3118 = vmatpush3.bf16.msra.mxu0 %v748_v31  ;;  %3419 = vpow2.f32 %v697_v29  ;;  %v686_v46 = vsub.f32 %v651_v3, %v678_v45 }
 0x318   : > { %v3416_v34 = vpop.eup %3415  ;;  %3129 = vmatprep.subr.bf16.mxu0 %v3727_v6  ;;  %3421 = vpow2.f32 %v693_v30 }
 0x319   : > { %v706_v35 = vsel %vm654_vm3, %v3416_v34, 0.0  ;;  %3423 = vpow2.f32 %v699_v44  ;;  %v701_v47 = vmul.f32 1.442695, %v686_v46 }
 0x31a   : > { %707 = vadd.xlane.f32.xlu0 %v706_v35  ;;  %716 = vadd.xlane.f32.xlu1 %v715_v36 }
 0x31b   : > { %3425 = vpow2.f32 %v701_v47 }
 0x31c   : > { %v4008_v37 = vpop.eup %3417 }
 0x31d   : > { %v709_v38 = vsel %vm654_vm3, %v4008_v37, 0.0 }
 0x31e   : > { %710 = vadd.xlane.f32.xlu1 %v709_v38 }
 0x324   : > { %v3420_v39 = vpop.eup %3419 }
 0x325   : > { %v718_v40 = vsel %vm654_vm3, %v3420_v39, 0.0  ;;  %v4013_v41 = vpop.eup %3421 }
 0x326   : > { %719 = vadd.xlane.f32.xlu0 %v718_v40  ;;  %v712_v42 = vsel %vm654_vm3, %v4013_v41, 0.0  ;;  %v4024_v48 = vpop.eup %3423 }
 0x327   : > { %v721_v49 = vsel %vm654_vm3, %v4024_v48, 0.0 }
 0x328   : > { %v4028_v50 = vpop.eup %3425 }
 0x329   : > { %v724_v51 = vsel %vm654_vm3, %v4028_v50, 0.0 }
 0x32a   : > { %713 = vadd.xlane.f32.xlu0 %v712_v42 }
 0x32f   : > { %841 = vrot.lane.b32.xlu1 %v3954_v24, %s3730_s9 }
 0x333   : > { %888 = vrot.lane.b32.xlu1 %v3960_v27, %s3730_s9 }
 0x340   : > { %794 = vrot.lane.b32.xlu0 %v3958_v26, %s3730_s9 }
 0x357   : > { %722 = vadd.xlane.f32.xlu1 %v721_v49 }
 0x35f   : > { %725 = vadd.xlane.f32.xlu0 %v724_v51 }
 0x368   : > { %1032 = vrot.lane.b32.xlu1 %v3958_v26, %s3731_s10 }
 0x36c   : > { %1083 = vrot.lane.b32.xlu1 %v3954_v24, %s3731_s10 }
 0x370   : > { %1134 = vrot.lane.b32.xlu1 %v3960_v27, %s3731_s10 }
 0x374   : > { %1132 = vrot.lane.b32.xlu1 %v3960_v27, %s3732_s13 }
 0x375   : > { %981 = vrot.lane.b32.xlu0 %v3952_v23, %s3731_s10 }
 0x379   : > { %979 = vrot.lane.b32.xlu0 %v3952_v23, %s3732_s13 }
 0x37d   : > { %1030 = vrot.lane.b32.xlu0 %v3958_v26, %s3732_s13 }
 0x381   : > { %1081 = vrot.lane.b32.xlu0 %v3954_v24, %s3732_s13  ;;  %s314_s13 = scalar_lea.vmem [#allocation11], %s2876_s30 }
 0x39f   : > { %v705_v52 = vpop.xlane.xlu1 %704 }
 0x3a0   : > { %3427 = vrcp.f32 %v705_v52 }
 0x3a3   : > { %v708_v53 = vpop.xlane.xlu0 %707  ;;  %v717_v54 = vpop.xlane.xlu1 %716 }
 0x3a4   : > { %3429 = vrcp.f32 %v708_v53 }
 0x3a5   : > { %3431 = vrcp.f32 %v717_v54  ;;  %v977_v54 = vld [vmem:[#allocation9 + $0x10] sm:$0xff] }
 0x3a7   : > { %v711_v56 = vpop.xlane.xlu1 %710 }
 0x3ab   : > { %v842_v63 = vpop.permute.xlu1 %841 }
 0x3ad   : > { %v3428_v55 = vpop.eup %3427 }
 0x3ae   : > { %v735_v59 = vmul.f32 %v3428_v55, %v3412_v28 }
 0x3af   : > { %v720_v57 = vpop.xlane.xlu0 %719  ;;  %v889_v12 = vpop.permute.xlu1 %888 }
 0x3b0   : > { %3433 = vrcp.f32 %v720_v57 }
 0x3b1   : > { %v3430_v58 = vpop.eup %3429  ;;  %3435 = vrcp.f32 %v711_v56 }
 0x3b2   : > { %v736_v60 = vmul.f32 %v3430_v58, %v3416_v34  ;;  %v3432_v1 = vpop.eup %3431  ;;  %v978_v58 = vld [vmem:[#allocation9 + $0x18] sm:$0xff] }
 0x3b3   : > { %v714_v61 = vpop.xlane.xlu0 %713  ;;  %v739_v3 = vmul.f32 %v3432_v1, %v4002_v33 }
 0x3b4   : > { %v743_v62 = vpack.c.bf16 %v736_v60, %v735_v59  ;;  %3437 = vrcp.f32 %v714_v61 }
 0x3b6   : > { %3120 = vmatmul.mubr.msk.bf16.vlgmr.msra.gmra.mxu0 %vm654_vm3, %v743_v62 }
 0x3b7   : > { %3130 = vmatpush3.bf16.msra.mxu0 %v842_v63  ;;  %3131 = vmatprep.mubr.msk.bf16.mxu0 %vm3728_vm1, %v3727_v6  ;;  %v795_v0 = vpop.permute.xlu0 %794 }
 0x3b8   : > { %3141 = vmatprep.subr.bf16.mxu0 %v3727_v6  ;;  %3124 = vmatpush3.bf16.msra.mxu1 %v795_v0 }
 0x3b9   : > { %3135 = vmatprep.subr.bf16.mxu1 %v3727_v6 }
 0x3bd   : > { %v3434_v2 = vpop.eup %3433 }
 0x3be   : > { %v740_v4 = vmul.f32 %v3434_v2, %v3420_v39  ;;  %v3436_v5 = vpop.eup %3435 }
 0x3bf   : > { %v737_v9 = vmul.f32 %v3436_v5, %v4008_v37 }
 0x3c0   : > { %v745_v7 = vpack.c.bf16 %v740_v4, %v739_v3 }
 0x3c1   : > { %v3438_v8 = vpop.eup %3437 }
 0x3c2   : > { %3132 = vmatmul.mubr.msk.bf16.vlgmr.msra.gmra.mxu0 %vm654_vm3, %v745_v7  ;;  %v738_v10 = vmul.f32 %v3438_v8, %v4013_v41 }
 0x3c3   : > { %3143 = vmatprep.mubr.msk.bf16.mxu0 %vm3728_vm1, %v3727_v6 }
 0x3c4   : > { %v744_v11 = vpack.c.bf16 %v738_v10, %v737_v9 }
 0x3c6   : > { %3126 = vmatmul.mubr.msk.bf16.vlgmr.msra.gmra.mxu1 %vm654_vm3, %v744_v11 }
 0x3c7   : > { %3136 = vmatpush3.bf16.msra.mxu1 %v889_v12  ;;  %3137 = vmatprep.mubr.msk.bf16.mxu1 %vm3728_vm1, %v3727_v6 }
 0x3c8   : > { %3147 = vmatprep.subr.bf16.mxu1 %v3727_v6 }
 0x3e0   : > { %v723_v13 = vpop.xlane.xlu1 %722 }
 0x3e1   : > { %3439 = vrcp.f32 %v723_v13 }
 0x3e4   : > { %v1033_v15 = vpop.permute.xlu1 %1032 }
 0x3e5   : > { %v1038_v31 = vsel %vm456_vm2, %v1033_v15, 0 }
 0x3e8   : > { %v726_v14 = vpop.xlane.xlu0 %725  ;;  %v1084_v19 = vpop.permute.xlu1 %1083 }
 0x3e9   : > { %3441 = vrcp.f32 %v726_v14  ;;  %v1089_v21 = vsel %vm456_vm2, %v1084_v19, 0 }
 0x3ec   : > { %v982_v16 = vpop.permute.xlu0 %981  ;;  %v1135_v33 = vpop.permute.xlu1 %1134 }
 0x3ed   : > { %v987_v17 = vsel %vm456_vm2, %v982_v16, 0  ;;  %v1140_v34 = vsel %vm456_vm2, %v1135_v33, 0 }
 0x3ee   : > { %3142 = vmatpush3.bf16.xpose.msra.mxu0 %v987_v17  ;;  %v3440_v20 = vpop.eup %3439 }
 0x3ef   : > { %3153 = vmatprep.subr.bf16.mxu0 %v3727_v6  ;;  %v741_v28 = vmul.f32 %v3440_v20, %v4024_v48 }
 0x3f0   : > { %v980_v18 = vpop.permute.xlu0 %979  ;;  %v1133_v35 = vpop.permute.xlu1 %1132 }
 0x3f4   : > { %v1031_v25 = vpop.permute.xlu0 %1030 }
 0x3f5   : > { %3144 = vmatmul.mubr.msk.bf16.vlgmr.msra.gmra.mxu0 %vm456_vm2, %v980_v18 }
 0x3f6   : > { %v3442_v22 = vpop.eup %3441  ;;  %3154 = vmatpush3.bf16.xpose.msra.mxu0 %v1089_v21  ;;  %3155 = vmatprep.mubr.msk.bf16.mxu0 %vm3728_vm1, %v3727_v6 }
 0x3f7   : > { %v742_v29 = vmul.f32 %v3442_v22, %v4028_v50  ;;  %3165 = vmatprep.subr.bf16.mxu0 %v3727_v6 }
 0x3f8   : > { %v1082_v32 = vpop.permute.xlu0 %1081 }
 0x3f9   : > { %v746_v30 = vpack.c.bf16 %v742_v29, %v741_v28 }
 0x3fb   : > { %3138 = vmatmul.mubr.msk.bf16.vlgmr.msra.gmra.mxu1 %vm654_vm3, %v746_v30 }
 0x3fc   : > { %3148 = vmatpush3.bf16.xpose.msra.mxu1 %v1038_v31  ;;  %3149 = vmatprep.mubr.msk.bf16.mxu1 %vm3728_vm1, %v3727_v6 }
 0x3fd   : > { %3156 = vmatmul.mubr.msk.bf16.vlgmr.msra.gmra.mxu0 %vm456_vm2, %v1082_v32  ;;  %3159 = vmatprep.subr.bf16.mxu1 %v3727_v6 }
 0x3fe   : > { %3167 = vmatprep.mubr.msk.bf16.mxu0 %vm3728_vm1, %v3727_v6 }
 0x403   : > { %3150 = vmatmul.mubr.msk.bf16.vlgmr.msra.gmra.mxu1 %vm456_vm2, %v1031_v25 }
 0x404   : > { %3160 = vmatpush3.bf16.xpose.msra.mxu1 %v1140_v34  ;;  %3161 = vmatprep.mubr.msk.bf16.mxu1 %vm3728_vm1, %v3727_v6 }
 0x405   : > { %3171 = vmatprep.subr.bf16.mxu1 %v3727_v6 }
 0x40b   : > { %3162 = vmatmul.mubr.msk.bf16.vlgmr.msra.gmra.mxu1 %vm456_vm2, %v1133_v35 }
 0x40c   : > { %3173 = vmatprep.mubr.msk.bf16.mxu1 %vm3728_vm1, %v3727_v6 }
 0x476   : > { %v787_v36 = vpop.f32.mrf.mxu0 }
 0x477   : > { %v2971_v37 = vpack.c.bf16 %v787_v36, %v787_v36 }
 0x478   : > { %v3121_v38 = vpop.f32.mrf.mxu0 }
 0x479   : > { %968 = vst.msk [vmem:[#allocation2] sm:$0xf] %vm967_vm4, %v2971_v37 }
 0x47a   : > { %v790_v39 = vpop.f32.mrf.mxu0 }
 0x47b   : > { %v2972_v40 = vpack.c.bf16 %v790_v39, %v790_v39 }
 0x47c   : > { %v3122_v41 = vpop.f32.mrf.mxu0 }
 0x47d   : > { %969 = vst.msk [vmem:[#allocation2 + $0x4] sm:$0xf] %vm967_vm4, %v2972_v40 }
 0x482   : > { %v881_v42 = vpop.f32.mrf.mxu0 }
 0x483   : > { %v2975_v43 = vpack.c.bf16 %v881_v42, %v881_v42 }
 0x484   : > { %v3133_v44 = vpop.f32.mrf.mxu0 }
 0x485   : > { %972 = vst.msk [vmem:[#allocation2 + $0x10] sm:$0xf] %vm967_vm4, %v2975_v43 }
 0x486   : > { %v834_v45 = vpop.f32.mrf.mxu1  ;;  %v884_v46 = vpop.f32.mrf.mxu0 }
 0x487   : > { %v2973_v47 = vpack.c.bf16 %v834_v45, %v834_v45  ;;  %v2976_v48 = vpack.c.bf16 %v884_v46, %v884_v46 }
 0x488   : > { %v3127_v49 = vpop.f32.mrf.mxu1  ;;  %v3134_v50 = vpop.f32.mrf.mxu0 }
 0x489   : > { %970 = vst.msk [vmem:[#allocation2 + $0x8] sm:$0xf] %vm967_vm4, %v2973_v47  ;;  %973 = vst.msk [vmem:[#allocation2 + $0x14] sm:$0xf] %vm967_vm4, %v2976_v48 }
 0x48a   : > { %v837_v51 = vpop.f32.mrf.mxu1 }
 0x48b   : > { %v2974_v52 = vpack.c.bf16 %v837_v51, %v837_v51 }
 0x48c   : > { %v3128_v53 = vpop.f32.mrf.mxu1 }
 0x48d   : > { %971 = vst.msk [vmem:[#allocation2 + $0xc] sm:$0xf] %vm967_vm4, %v2974_v52 }
 0x4b5   : > { %v1023_v55 = vpop.f32.mrf.mxu0 }
 0x4b6   : > { %v1024_v56 = vadd.f32 %v1023_v55, %v977_v54 }
 0x4b7   : > { %v3145_v57 = vpop.f32.mrf.mxu0 }
 0x4b8   : > { %v1183_v59 = vsel %vm654_vm3, %v1024_v56, -inf }
 0x4b9   : > { %1184 = vmax.xlane.f32.xlu0 %v1183_v59  ;;  %v1026_v60 = vpop.f32.mrf.mxu0 }
 0x4ba   : > { %v1027_v61 = vadd.f32 %v1026_v60, %v978_v58 }
 0x4bb   : > { %v928_v62 = vpop.f32.mrf.mxu1  ;;  %v3146_v63 = vpop.f32.mrf.mxu0 }
 0x4bc   : > { %v2977_v0 = vpack.c.bf16 %v928_v62, %v928_v62  ;;  %v1186_v1 = vsel %vm654_vm3, %v1027_v61, -inf }
 0x4bd   : > { %v3139_v2 = vpop.f32.mrf.mxu1  ;;  %1187 = vmax.xlane.f32.xlu1 %v1186_v1  ;;  %v1125_v3 = vpop.f32.mrf.mxu0 }
 0x4be   : > { %974 = vst.msk [vmem:[#allocation2 + $0x18] sm:$0xf] %vm967_vm4, %v2977_v0  ;;  %v1126_v4 = vadd.f32 %v1125_v3, %v977_v54 }
 0x4bf   : > { %v931_v5 = vpop.f32.mrf.mxu1  ;;  %v3157_v7 = vpop.f32.mrf.mxu0 }
 0x4c0   : > { %v2978_v8 = vpack.c.bf16 %v931_v5, %v931_v5  ;;  %v1195_v9 = vsel %vm654_vm3, %v1126_v4, -inf }
 0x4c1   : > { %v3140_v10 = vpop.f32.mrf.mxu1  ;;  %1196 = vmax.xlane.f32.xlu1 %v1195_v9  ;;  %v1128_v11 = vpop.f32.mrf.mxu0 }
 0x4c2   : > { %975 = vst.msk [vmem:[#allocation2 + $0x1c] sm:$0xf] %vm967_vm4, %v2978_v8  ;;  %v1129_v20 = vadd.f32 %v1128_v11, %v978_v58 }
 0x4c3   : > { %v1074_v12 = vpop.f32.mrf.mxu1  ;;  %v3158_v13 = vpop.f32.mrf.mxu0 }
 0x4c4   : > { %v1075_v14 = vadd.f32 %v1074_v12, %v977_v54  ;;  %v1198_v30 = vsel %vm654_vm3, %v1129_v20, -inf }
 0x4c5   : > { %v3151_v15 = vpop.f32.mrf.mxu1 }
 0x4c6   : > { %v1189_v16 = vsel %vm654_vm3, %v1075_v14, -inf }
 0x4c7   : > { %1190 = vmax.xlane.f32.xlu0 %v1189_v16  ;;  %v1077_v17 = vpop.f32.mrf.mxu1 }
 0x4c8   : > { %v1078_v18 = vadd.f32 %v1077_v17, %v978_v58 }
 0x4c9   : > { %v3152_v19 = vpop.f32.mrf.mxu1 }
 0x4ca   : > { %v1192_v21 = vsel %vm654_vm3, %v1078_v18, -inf }
 0x4cb   : > { %1193 = vmax.xlane.f32.xlu0 %v1192_v21  ;;  %v1176_v22 = vpop.f32.mrf.mxu1 }
 0x4cc   : > { %v1177_v25 = vadd.f32 %v1176_v22, %v977_v54 }
 0x4cd   : > { %v3163_v28 = vpop.f32.mrf.mxu1 }
 0x4ce   : > { %v1201_v29 = vsel %vm654_vm3, %v1177_v25, -inf }
 0x4cf   : > { %v1179_v31 = vpop.f32.mrf.mxu1  ;;  %1202 = vmax.xlane.f32.xlu1 %v1201_v29  ;;  %1199 = vmax.xlane.f32.xlu0 %v1198_v30 }
 0x4d0   : > { %v1180_v32 = vadd.f32 %v1179_v31, %v978_v58 }
 0x4d1   : > { %v3164_v33 = vpop.f32.mrf.mxu1 }
 0x4d2   : > { %v1204_v34 = vsel %vm654_vm3, %v1180_v32, -inf }
 0x4d3   : > { %1205 = vmax.xlane.f32.xlu0 %v1204_v34 }
 0x4e0   : > { %1275 = vrot.lane.b32.xlu1 %v3952_v23, %s3733_s7 }
 0x4e4   : > { %1369 = vrot.lane.b32.xlu1 %v3954_v24, %s3733_s7 }
 0x4e8   : > { %1416 = vrot.lane.b32.xlu1 %v3960_v27, %s3733_s7 }
 0x4e9   : > { %1322 = vrot.lane.b32.xlu0 %v3958_v26, %s3733_s7  ;;  %s3004_s7 = sshll.u32 %s3801_s25, 10  ;;  %s2745_s25 = scalar_lea.sflag [#allocation5], %s3923_s14 }
 0x542   : > { %v1185_v35 = vpop.xlane.xlu0 %1184 }
 0x543   : > { %v1207_v36 = vsub.f32 %v1024_v56, %v1185_v35 }
 0x545   : > { %v1215_v37 = vmul.f32 1.442695, %v1207_v36 }
 0x546   : > { %v1188_v38 = vpop.xlane.xlu1 %1187 }
 0x547   : > { %3443 = vpow2.f32 %v1215_v37  ;;  %v1208_v39 = vsub.f32 %v1027_v61, %v1188_v38 }
 0x549   : > { %v1217_v40 = vmul.f32 1.442695, %v1208_v39 }
 0x54a   : > { %v1197_v41 = vpop.xlane.xlu1 %1196 }
 0x54b   : > { %3445 = vpow2.f32 %v1217_v40  ;;  %v1211_v42 = vsub.f32 %v1126_v4, %v1197_v41 }
 0x54d   : > { %v1223_v45 = vmul.f32 1.442695, %v1211_v42 }
 0x550   : > { %v1191_v43 = vpop.xlane.xlu0 %1190 }
 0x551   : > { %v1209_v44 = vsub.f32 %v1075_v14, %v1191_v43 }
 0x553   : > { %v1219_v46 = vmul.f32 1.442695, %v1209_v44 }
 0x554   : > { %v4100_v47 = vpop.eup %3443  ;;  %v1194_v48 = vpop.xlane.xlu0 %1193 }
 0x555   : > { %3447 = vpow2.f32 %v1219_v46  ;;  %v1210_v49 = vsub.f32 %v1078_v18, %v1194_v48  ;;  %v1231_v50 = vsel %vm654_vm3, %v4100_v47, 0.0 }
 0x556   : > { %1232 = vadd.xlane.f32.xlu1 %v1231_v50  ;;  %3449 = vpow2.f32 %v1223_v45 }
 0x557   : > { %v1221_v51 = vmul.f32 1.442695, %v1210_v49 }
 0x558   : > { %v4104_v52 = vpop.eup %3445  ;;  %v1203_v53 = vpop.xlane.xlu1 %1202 }
 0x559   : > { %v1200_v54 = vpop.xlane.xlu0 %1199  ;;  %3451 = vpow2.f32 %v1221_v51  ;;  %v1213_v55 = vsub.f32 %v1177_v25, %v1203_v53  ;;  %v1234_v57 = vsel %vm654_vm3, %v4104_v52, 0.0 }
 0x55a   : > { %v1212_v56 = vsub.f32 %v1129_v20, %v1200_v54  ;;  %1235 = vadd.xlane.f32.xlu0 %v1234_v57 }
 0x55b   : > { %v1227_v58 = vmul.f32 1.442695, %v1213_v55 }
 0x55c   : > { %v1225_v59 = vmul.f32 1.442695, %v1212_v56  ;;  %v1276_v60 = vpop.permute.xlu1 %1275 }
 0x55d   : > { %v1206_v61 = vpop.xlane.xlu0 %1205  ;;  %3453 = vpow2.f32 %v1227_v58  ;;  %3166 = vmatpush3.bf16.msra.mxu0 %v1276_v60 }
 0x55e   : > { %v1214_v62 = vsub.f32 %v1180_v32, %v1206_v61  ;;  %3455 = vpow2.f32 %v1225_v59  ;;  %3177 = vmatprep.subr.bf16.mxu0 %v3727_v6 }
 0x560   : > { %v1229_v63 = vmul.f32 1.442695, %v1214_v62  ;;  %v1370_v14 = vpop.permute.xlu1 %1369 }
 0x561   : > { %v1323_v0 = vpop.permute.xlu0 %1322 }
 0x562   : > { %3457 = vpow2.f32 %v1229_v63  ;;  %3172 = vmatpush3.bf16.msra.mxu1 %v1323_v0  ;;  %v3448_v1 = vpop.eup %3447 }
 0x563   : > { %3183 = vmatprep.subr.bf16.mxu1 %v3727_v6  ;;  %v1237_v2 = vsel %vm654_vm3, %v3448_v1, 0.0  ;;  %v3450_v3 = vpop.eup %3449 }
 0x564   : > { %1238 = vadd.xlane.f32.xlu1 %v1237_v2  ;;  %v1243_v5 = vsel %vm654_vm3, %v3450_v3, 0.0  ;;  %v1417_v15 = vpop.permute.xlu1 %1416 }
 0x566   : > { %v3452_v4 = vpop.eup %3451 }
 0x567   : > { %v1240_v7 = vsel %vm654_vm3, %v3452_v4, 0.0 }
 0x568   : > { %1244 = vadd.xlane.f32.xlu1 %v1243_v5  ;;  %1241 = vadd.xlane.f32.xlu0 %v1240_v7 }
 0x56a   : > { %v4113_v8 = vpop.eup %3453 }
 0x56b   : > { %v3456_v9 = vpop.eup %3455  ;;  %v1249_v10 = vsel %vm654_vm3, %v4113_v8, 0.0 }
 0x56c   : > { %1250 = vadd.xlane.f32.xlu1 %v1249_v10  ;;  %v1246_v11 = vsel %vm654_vm3, %v3456_v9, 0.0 }
 0x56d   : > { %1247 = vadd.xlane.f32.xlu0 %v1246_v11  ;;  %v1521_v11 = vld [vmem:[#allocation9 + $0x20] sm:$0xff] }
 0x56f   : > { %v3458_v12 = vpop.eup %3457 }
 0x570   : > { %v1252_v13 = vsel %vm654_vm3, %v3458_v12, 0.0 }
 0x571   : > { %1253 = vadd.xlane.f32.xlu0 %v1252_v13 }
 0x57d   : > { %1576 = vrot.lane.b32.xlu1 %v3958_v26, %s3734_s8 }
 0x581   : > { %1627 = vrot.lane.b32.xlu1 %v3954_v24, %s3734_s8 }
 0x585   : > { %1678 = vrot.lane.b32.xlu1 %v3960_v27, %s3734_s8 }
 0x587   : > { %1525 = vrot.lane.b32.xlu0 %v3952_v23, %s3734_s8  ;;  %s2759_s8 = sshll.u32 %s314_s13, 4  ;;  %s4423_s8 = int_to_ptr.vmem [resolvable:$true] %s2759_s8 }
 0x589   : > { %1676 = vrot.lane.b32.xlu1 %v3960_v27, %s3735_s19 }
 0x58b   : > { %1523 = vrot.lane.b32.xlu0 %v3952_v23, %s3735_s19 }
 0x58f   : > { %1574 = vrot.lane.b32.xlu0 %v3958_v26, %s3735_s19 }
 0x593   : > { %1625 = vrot.lane.b32.xlu0 %v3954_v24, %s3735_s19 }
 0x5df   : > { %v1233_v16 = vpop.xlane.xlu1 %1232 }
 0x5e0   : > { %3459 = vrcp.f32 %v1233_v16 }
 0x5e3   : > { %v1236_v17 = vpop.xlane.xlu0 %1235 }
 0x5e4   : > { %3461 = vrcp.f32 %v1236_v17  ;;  %v1522_v17 = vld [vmem:[#allocation9 + $0x28] sm:$0xff] }
 0x5ed   : > { %v1239_v18 = vpop.xlane.xlu1 %1238  ;;  %v3460_v19 = vpop.eup %3459 }
 0x5ee   : > { %3463 = vrcp.f32 %v1239_v18  ;;  %v1263_v25 = vmul.f32 %v3460_v19, %v4100_v47 }
 0x5f1   : > { %v3462_v20 = vpop.eup %3461  ;;  %v1245_v21 = vpop.xlane.xlu1 %1244 }
 0x5f2   : > { %v1242_v22 = vpop.xlane.xlu0 %1241  ;;  %v1264_v28 = vmul.f32 %v3462_v20, %v4104_v52 }
 0x5f3   : > { %3465 = vrcp.f32 %v1242_v22 }
 0x5f4   : > { %v1271_v29 = vpack.c.bf16 %v1264_v28, %v1263_v25  ;;  %3467 = vrcp.f32 %v1245_v21 }
 0x5f5   : > { %v1251_v30 = vpop.xlane.xlu1 %1250 }
 0x5f6   : > { %v1248_v31 = vpop.xlane.xlu0 %1247  ;;  %3168 = vmatmul.mubr.msk.bf16.vlgmr.msra.gmra.mxu0 %vm654_vm3, %v1271_v29 }
 0x5f7   : > { %3469 = vrcp.f32 %v1248_v31  ;;  %3178 = vmatpush3.bf16.msra.mxu0 %v1370_v14  ;;  %3179 = vmatprep.mubr.msk.bf16.mxu0 %vm3728_vm1, %v3727_v6 }
 0x5f8   : > { %3189 = vmatprep.subr.bf16.mxu0 %v3727_v6  ;;  %3471 = vrcp.f32 %v1251_v30 }
 0x5f9   : > { %v1577_v43 = vpop.permute.xlu1 %1576 }
 0x5fa   : > { %v1254_v32 = vpop.xlane.xlu0 %1253  ;;  %v1582_v53 = vsel %vm456_vm2, %v1577_v43, 0 }
 0x5fb   : > { %3473 = vrcp.f32 %v1254_v32  ;;  %v3464_v33 = vpop.eup %3463 }
 0x5fc   : > { %v1265_v35 = vmul.f32 %v3464_v33, %v3448_v1 }
 0x5fd   : > { %v1628_v51 = vpop.permute.xlu1 %1627 }
 0x5fe   : > { %v1526_v44 = vpop.permute.xlu0 %1525  ;;  %v1633_v54 = vsel %vm456_vm2, %v1628_v51, 0 }
 0x5ff   : > { %v1531_v47 = vsel %vm456_vm2, %v1526_v44, 0 }
 0x600   : > { %v3466_v34 = vpop.eup %3465 }
 0x601   : > { %v1266_v36 = vmul.f32 %v3466_v34, %v3452_v4  ;;  %v3468_v37 = vpop.eup %3467  ;;  %v1679_v55 = vpop.permute.xlu1 %1678 }
 0x602   : > { %v1267_v40 = vmul.f32 %v3468_v37, %v3450_v3  ;;  %v1524_v52 = vpop.permute.xlu0 %1523  ;;  %v1684_v57 = vsel %vm456_vm2, %v1679_v55, 0 }
 0x603   : > { %v1272_v38 = vpack.c.bf16 %v1266_v36, %v1265_v35 }
 0x604   : > { %v3470_v39 = vpop.eup %3469 }
 0x605   : > { %3174 = vmatmul.mubr.msk.bf16.vlgmr.msra.gmra.mxu1 %vm654_vm3, %v1272_v38  ;;  %v1268_v41 = vmul.f32 %v3470_v39, %v3456_v9  ;;  %v3472_v42 = vpop.eup %3471  ;;  %v1677_v59 = vpop.permute.xlu1 %1676 }
 0x606   : > { %3184 = vmatpush3.bf16.msra.mxu1 %v1417_v15  ;;  %3185 = vmatprep.mubr.msk.bf16.mxu1 %vm3728_vm1, %v3727_v6  ;;  %v1269_v48 = vmul.f32 %v3472_v42, %v4113_v8  ;;  %v1575_v56 = vpop.permute.xlu0 %1574 }
 0x607   : > { %v1273_v45 = vpack.c.bf16 %v1268_v41, %v1267_v40  ;;  %3195 = vmatprep.subr.bf16.mxu1 %v3727_v6 }
 0x608   : > { %v3474_v46 = vpop.eup %3473 }
 0x609   : > { %3180 = vmatmul.mubr.msk.bf16.vlgmr.msra.gmra.mxu0 %vm654_vm3, %v1273_v45  ;;  %v1270_v49 = vmul.f32 %v3474_v46, %v3458_v12 }
 0x60a   : > { %3190 = vmatpush3.bf16.xpose.msra.mxu0 %v1531_v47  ;;  %3191 = vmatprep.mubr.msk.bf16.mxu0 %vm3728_vm1, %v3727_v6  ;;  %v1626_v58 = vpop.permute.xlu0 %1625 }
 0x60b   : > { %v1274_v50 = vpack.c.bf16 %v1270_v49, %v1269_v48  ;;  %3201 = vmatprep.subr.bf16.mxu0 %v3727_v6 }
 0x60d   : > { %3186 = vmatmul.mubr.msk.bf16.vlgmr.msra.gmra.mxu1 %vm654_vm3, %v1274_v50 }
 0x60e   : > { %3196 = vmatpush3.bf16.xpose.msra.mxu1 %v1582_v53  ;;  %3197 = vmatprep.mubr.msk.bf16.mxu1 %vm3728_vm1, %v3727_v6 }
 0x60f   : > { %3207 = vmatprep.subr.bf16.mxu1 %v3727_v6 }
 0x611   : > { %3192 = vmatmul.mubr.msk.bf16.vlgmr.msra.gmra.mxu0 %vm456_vm2, %v1524_v52 }
 0x612   : > { %3202 = vmatpush3.bf16.xpose.msra.mxu0 %v1633_v54  ;;  %3203 = vmatprep.mubr.msk.bf16.mxu0 %vm3728_vm1, %v3727_v6 }
 0x613   : > { %3213 = vmatprep.subr.bf16.mxu0 %v3727_v6 }
 0x615   : > { %3198 = vmatmul.mubr.msk.bf16.vlgmr.msra.gmra.mxu1 %vm456_vm2, %v1575_v56 }
 0x616   : > { %3208 = vmatpush3.bf16.xpose.msra.mxu1 %v1684_v57  ;;  %3209 = vmatprep.mubr.msk.bf16.mxu1 %vm3728_vm1, %v3727_v6 }
 0x617   : > { %3219 = vmatprep.subr.bf16.mxu1 %v3727_v6 }
 0x619   : > { %3204 = vmatmul.mubr.msk.bf16.vlgmr.msra.gmra.mxu0 %vm456_vm2, %v1626_v58 }
 0x61a   : > { %3215 = vmatprep.mubr.msk.bf16.mxu0 %vm3728_vm1, %v3727_v6 }
 0x61d   : > { %3210 = vmatmul.mubr.msk.bf16.vlgmr.msra.gmra.mxu1 %vm456_vm2, %v1677_v59 }
 0x61e   : > { %3221 = vmatprep.mubr.msk.bf16.mxu1 %vm3728_vm1, %v3727_v6 }
 0x6b6   : > { %v4164_v60 = vpop.f32.mrf.mxu0 }
 0x6b8   : > { %v3169_v61 = vpop.f32.mrf.mxu0 }
 0x6ba   : > { %v4166_v62 = vpop.f32.mrf.mxu0 }
 0x6bc   : > { %v3170_v63 = vpop.f32.mrf.mxu0 }
 0x6c5   : > { %v4168_v0 = vpop.f32.mrf.mxu1 }
 0x6c7   : > { %v3175_v1 = vpop.f32.mrf.mxu1 }
 0x6c9   : > { %v4170_v2 = vpop.f32.mrf.mxu1  ;;  %v4172_v3 = vpop.f32.mrf.mxu0 }
 0x6cb   : > { %v3176_v4 = vpop.f32.mrf.mxu1  ;;  %v3181_v5 = vpop.f32.mrf.mxu0 }
 0x6cd   : > { %v4174_v7 = vpop.f32.mrf.mxu0  ;;  %v4176_v8 = vpop.f32.mrf.mxu1 }
 0x6cf   : > { %v3182_v9 = vpop.f32.mrf.mxu0  ;;  %v3187_v10 = vpop.f32.mrf.mxu1 }
 0x6d1   : > { %v4178_v12 = vpop.f32.mrf.mxu1  ;;  %v1567_v13 = vpop.f32.mrf.mxu0 }
 0x6d2   : > { %v1568_v14 = vadd.f32 %v1567_v13, %v1521_v11 }
 0x6d3   : > { %v3188_v15 = vpop.f32.mrf.mxu1  ;;  %v3193_v16 = vpop.f32.mrf.mxu0 }
 0x6d4   : > { %v1727_v18 = vsel %vm654_vm3, %v1568_v14, -inf }
 0x6d5   : > { %1728 = vmax.xlane.f32.xlu0 %v1727_v18  ;;  %v1570_v19 = vpop.f32.mrf.mxu0  ;;  %v1618_v20 = vpop.f32.mrf.mxu1 }
 0x6d6   : > { %v1571_v21 = vadd.f32 %v1570_v19, %v1522_v17  ;;  %v1619_v22 = vadd.f32 %v1618_v20, %v1521_v11 }
 0x6d7   : > { %v3194_v25 = vpop.f32.mrf.mxu0  ;;  %v3199_v28 = vpop.f32.mrf.mxu1 }
 0x6d8   : > { %v1730_v29 = vsel %vm654_vm3, %v1571_v21, -inf  ;;  %v1733_v30 = vsel %vm654_vm3, %v1619_v22, -inf }
 0x6d9   : > { %1731 = vmax.xlane.f32.xlu1 %v1730_v29  ;;  %1734 = vmax.xlane.f32.xlu0 %v1733_v30  ;;  %v1621_v31 = vpop.f32.mrf.mxu1  ;;  %v1669_v32 = vpop.f32.mrf.mxu0 }
 0x6da   : > { %v1622_v33 = vadd.f32 %v1621_v31, %v1522_v17  ;;  %v1670_v34 = vadd.f32 %v1669_v32, %v1521_v11 }
 0x6db   : > { %v3200_v35 = vpop.f32.mrf.mxu1  ;;  %v3205_v36 = vpop.f32.mrf.mxu0 }
 0x6dc   : > { %v1736_v37 = vsel %vm654_vm3, %v1622_v33, -inf  ;;  %v1739_v38 = vsel %vm654_vm3, %v1670_v34, -inf }
 0x6dd   : > { %1737 = vmax.xlane.f32.xlu0 %v1736_v37  ;;  %v1720_v39 = vpop.f32.mrf.mxu1  ;;  %1740 = vmax.xlane.f32.xlu1 %v1739_v38  ;;  %v1672_v40 = vpop.f32.mrf.mxu0 }
 0x6de   : > { %v1721_v41 = vadd.f32 %v1720_v39, %v1521_v11  ;;  %v1673_v42 = vadd.f32 %v1672_v40, %v1522_v17 }
 0x6df   : > { %v3206_v43 = vpop.f32.mrf.mxu0  ;;  %v3211_v44 = vpop.f32.mrf.mxu1 }
 0x6e0   : > { %v1745_v45 = vsel %vm654_vm3, %v1721_v41, -inf  ;;  %v1742_v46 = vsel %vm654_vm3, %v1673_v42, -inf }
 0x6e1   : > { %v1723_v47 = vpop.f32.mrf.mxu1  ;;  %1746 = vmax.xlane.f32.xlu1 %v1745_v45  ;;  %1743 = vmax.xlane.f32.xlu0 %v1742_v46 }
 0x6e2   : > { %v1724_v48 = vadd.f32 %v1723_v47, %v1522_v17 }
 0x6e3   : > { %v3212_v49 = vpop.f32.mrf.mxu1 }
 0x6e4   : > { %v1748_v50 = vsel %vm654_vm3, %v1724_v48, -inf }
 0x6e5   : > { %1749 = vmax.xlane.f32.xlu0 %v1748_v50 }
 0x6f2   : > { %1819 = vrot.lane.b32.xlu1 %v3952_v23, %s3736_s16 }
 0x6f6   : > { %1913 = vrot.lane.b32.xlu1 %v3954_v24, %s3736_s16 }
 0x6fa   : > { %1960 = vrot.lane.b32.xlu1 %v3960_v27, %s3736_s16 }
 0x6fb   : > { %1866 = vrot.lane.b32.xlu0 %v3958_v26, %s3736_s16 }
 0x75e   : > { %v1729_v51 = vpop.xlane.xlu0 %1728 }
 0x75f   : > { %v1751_v52 = vsub.f32 %v1568_v14, %v1729_v51 }
 0x761   : > { %v1759_v53 = vmul.f32 1.442695, %v1751_v52 }
 0x762   : > { %v1732_v54 = vpop.xlane.xlu1 %1731  ;;  %v1735_v55 = vpop.xlane.xlu0 %1734 }
 0x763   : > { %3475 = vpow2.f32 %v1759_v53  ;;  %v1752_v56 = vsub.f32 %v1571_v21, %v1732_v54  ;;  %v1753_v57 = vsub.f32 %v1619_v22, %v1735_v55 }
 0x765   : > { %v1761_v58 = vmul.f32 1.442695, %v1752_v56  ;;  %v1763_v59 = vmul.f32 1.442695, %v1753_v57 }
 0x766   : > { %v1741_v61 = vpop.xlane.xlu1 %1740  ;;  %v1738_v63 = vpop.xlane.xlu0 %1737 }
 0x767   : > { %3477 = vpow2.f32 %v1761_v58  ;;  %v1755_v1 = vsub.f32 %v1670_v34, %v1741_v61  ;;  %v1754_v4 = vsub.f32 %v1622_v33, %v1738_v63 }
 0x768   : > { %3479 = vpow2.f32 %v1763_v59 }
 0x769   : > { %v1767_v5 = vmul.f32 1.442695, %v1755_v1  ;;  %v1765_v9 = vmul.f32 1.442695, %v1754_v4 }
 0x76a   : > { %v1747_v10 = vpop.xlane.xlu1 %1746  ;;  %v1744_v11 = vpop.xlane.xlu0 %1743 }
 0x76b   : > { %3481 = vpow2.f32 %v1767_v5  ;;  %v1757_v13 = vsub.f32 %v1721_v41, %v1747_v10  ;;  %v1756_v14 = vsub.f32 %v1673_v42, %v1744_v11 }
 0x76c   : > { %3483 = vpow2.f32 %v1765_v9 }
 0x76d   : > { %v1771_v15 = vmul.f32 1.442695, %v1757_v13  ;;  %v1769_v16 = vmul.f32 1.442695, %v1756_v14 }
 0x76e   : > { %v1820_v17 = vpop.permute.xlu1 %1819  ;;  %v1750_v18 = vpop.xlane.xlu0 %1749 }
 0x76f   : > { %3485 = vpow2.f32 %v1771_v15  ;;  %v1758_v19 = vsub.f32 %v1724_v48, %v1750_v18  ;;  %3214 = vmatpush3.bf16.msra.mxu0 %v1820_v17 }
 0x770   : > { %v3476_v20 = vpop.eup %3475  ;;  %3487 = vpow2.f32 %v1769_v16  ;;  %3225 = vmatprep.subr.bf16.mxu0 %v3727_v6 }
 0x771   : > { %v1773_v21 = vmul.f32 1.442695, %v1758_v19  ;;  %v1775_v22 = vsel %vm654_vm3, %v3476_v20, 0.0 }
 0x772   : > { %1776 = vadd.xlane.f32.xlu1 %v1775_v22  ;;  %v1867_v25 = vpop.permute.xlu0 %1866  ;;  %v1914_v42 = vpop.permute.xlu1 %1913 }
 0x773   : > { %3489 = vpow2.f32 %v1773_v21  ;;  %3220 = vmatpush3.bf16.msra.mxu1 %v1867_v25 }
 0x774   : > { %v3478_v28 = vpop.eup %3477  ;;  %3231 = vmatprep.subr.bf16.mxu1 %v3727_v6 }
 0x775   : > { %v3480_v29 = vpop.eup %3479  ;;  %v1778_v30 = vsel %vm654_vm3, %v3478_v28, 0.0 }
 0x776   : > { %1779 = vadd.xlane.f32.xlu0 %v1778_v30  ;;  %v1781_v31 = vsel %vm654_vm3, %v3480_v29, 0.0  ;;  %v1961_v43 = vpop.permute.xlu1 %1960 }
 0x777   : > { %1782 = vadd.xlane.f32.xlu1 %v1781_v31 }
 0x778   : > { %v3482_v32 = vpop.eup %3481 }
 0x779   : > { %v3484_v33 = vpop.eup %3483  ;;  %v1787_v34 = vsel %vm654_vm3, %v3482_v32, 0.0 }
 0x77a   : > { %v1784_v35 = vsel %vm654_vm3, %v3484_v33, 0.0 }
 0x77b   : > { %1788 = vadd.xlane.f32.xlu1 %v1787_v34  ;;  %1785 = vadd.xlane.f32.xlu0 %v1784_v35 }
 0x77c   : > { %v4199_v36 = vpop.eup %3485 }
 0x77d   : > { %v3488_v37 = vpop.eup %3487  ;;  %v1793_v38 = vsel %vm654_vm3, %v4199_v36, 0.0 }
 0x77e   : > { %v1790_v39 = vsel %vm654_vm3, %v3488_v37, 0.0 }
 0x77f   : > { %1794 = vadd.xlane.f32.xlu1 %v1793_v38  ;;  %1791 = vadd.xlane.f32.xlu0 %v1790_v39 }
 0x780   : > { %v3490_v40 = vpop.eup %3489 }
 0x781   : > { %v1796_v41 = vsel %vm654_vm3, %v3490_v40, 0.0 }
 0x783   : > { %1797 = vadd.xlane.f32.xlu0 %v1796_v41 }
 0x790   : > { %2120 = vrot.lane.b32.xlu1 %v3958_v26, %s3737_s20 }
 0x794   : > { %2171 = vrot.lane.b32.xlu1 %v3954_v24, %s3737_s20 }
 0x798   : > { %2222 = vrot.lane.b32.xlu1 %v3960_v27, %s3737_s20 }
 0x799   : > { %2069 = vrot.lane.b32.xlu0 %v3952_v23, %s3737_s20  ;;  %s4420_s20 = scalar_lea.hbm %s4473_s6, %s3004_s7 }
 0x79c   : > { %2220 = vrot.lane.b32.xlu1 %v3960_v27, %s3738_s15 }
 0x79d   : > { %2067 = vrot.lane.b32.xlu0 %v3952_v23, %s3738_s15 }
 0x7a1   : > { %2118 = vrot.lane.b32.xlu0 %v3958_v26, %s3738_s15 }
 0x7a5   : > { %2169 = vrot.lane.b32.xlu0 %v3954_v24, %s3738_s15  ;;  %s3645_s15 = scalar_lea.vmem %s4423_s8, 1024 }
 0x7a6   : > { %p3646_p7 = scmp.ne.s32.totalorder %s4423_s8, %s3645_s15 }
 0x7a8   : > { %p3647_p11 = pnand %p3646_p7, %p4494_p1 }
 0x7aa   : > { %p3648_p9 = pneg %p3647_p11 }
 0x7fb   : > { %v1777_v44 = vpop.xlane.xlu1 %1776 }
 0x7fc   : > { %3491 = vrcp.f32 %v1777_v44 }
 0x7ff   : > { %v1780_v45 = vpop.xlane.xlu0 %1779 }
 0x800   : > { %v1783_v46 = vpop.xlane.xlu1 %1782  ;;  %3493 = vrcp.f32 %v1780_v45 }
 0x801   : > { %3495 = vrcp.f32 %v1783_v46 }
 0x804   : > { %v1789_v47 = vpop.xlane.xlu1 %1788  ;;  %v1786_v48 = vpop.xlane.xlu0 %1785 }
 0x805   : > { %3497 = vrcp.f32 %v1786_v48 }
 0x806   : > { %3499 = vrcp.f32 %v1789_v47  ;;  %v2065_v47 = vld [vmem:[#allocation9 + $0x30] sm:$0xff] }
 0x808   : > { %v1795_v49 = vpop.xlane.xlu1 %1794  ;;  %v1792_v50 = vpop.xlane.xlu0 %1791 }
 0x809   : > { %3501 = vrcp.f32 %v1792_v50  ;;  %v3492_v51 = vpop.eup %3491 }
 0x80a   : > { %3503 = vrcp.f32 %v1795_v49  ;;  %v1807_v54 = vmul.f32 %v3492_v51, %v3476_v20 }
 0x80c   : > { %v1798_v52 = vpop.xlane.xlu0 %1797  ;;  %v2121_v11 = vpop.permute.xlu1 %2120 }
 0x80d   : > { %v3494_v53 = vpop.eup %3493  ;;  %3505 = vrcp.f32 %v1798_v52  ;;  %v2126_v22 = vsel %vm456_vm2, %v2121_v11, 0 }
 0x80e   : > { %v1808_v55 = vmul.f32 %v3494_v53, %v3478_v28  ;;  %v3496_v57 = vpop.eup %3495  ;;  %v2066_v53 = vld [vmem:[#allocation9 + $0x38] sm:$0xff] }
 0x80f   : > { %v1809_v59 = vmul.f32 %v3496_v57, %v3480_v29 }
 0x810   : > { %v1815_v56 = vpack.c.bf16 %v1808_v55, %v1807_v54  ;;  %v2070_v13 = vpop.permute.xlu0 %2069  ;;  %v2172_v20 = vpop.permute.xlu1 %2171 }
 0x811   : > { %v2075_v18 = vsel %vm456_vm2, %v2070_v13, 0  ;;  %v2177_v25 = vsel %vm456_vm2, %v2172_v20, 0 }
 0x812   : > { %3216 = vmatmul.mubr.msk.bf16.vlgmr.msra.gmra.mxu0 %vm654_vm3, %v1815_v56  ;;  %v3498_v58 = vpop.eup %3497 }
 0x813   : > { %3226 = vmatpush3.bf16.msra.mxu0 %v1914_v42  ;;  %3227 = vmatprep.mubr.msk.bf16.mxu0 %vm3728_vm1, %v3727_v6  ;;  %v1810_v61 = vmul.f32 %v3498_v58, %v3484_v33  ;;  %v3500_v63 = vpop.eup %3499 }
 0x814   : > { %3237 = vmatprep.subr.bf16.mxu0 %v3727_v6  ;;  %v1811_v9 = vmul.f32 %v3500_v63, %v3482_v32  ;;  %v2068_v21 = vpop.permute.xlu0 %2067  ;;  %v2223_v28 = vpop.permute.xlu1 %2222 }
 0x815   : > { %v1816_v1 = vpack.c.bf16 %v1810_v61, %v1809_v59  ;;  %v2228_v30 = vsel %vm456_vm2, %v2223_v28, 0 }
 0x816   : > { %v3502_v4 = vpop.eup %3501 }
 0x817   : > { %v3504_v5 = vpop.eup %3503  ;;  %3222 = vmatmul.mubr.msk.bf16.vlgmr.msra.gmra.mxu1 %vm654_vm3, %v1816_v1  ;;  %v1812_v10 = vmul.f32 %v3502_v4, %v3488_v37 }
 0x818   : > { %3232 = vmatpush3.bf16.msra.mxu1 %v1961_v43  ;;  %3233 = vmatprep.mubr.msk.bf16.mxu1 %vm3728_vm1, %v3727_v6  ;;  %v1813_v16 = vmul.f32 %v3504_v5, %v4199_v36  ;;  %v2119_v29 = vpop.permute.xlu0 %2118  ;;  %v2221_v32 = vpop.permute.xlu1 %2220 }
 0x819   : > { %v1817_v15 = vpack.c.bf16 %v1812_v10, %v1811_v9  ;;  %3243 = vmatprep.subr.bf16.mxu1 %v3727_v6 }
 0x81a   : > { %v3506_v14 = vpop.eup %3505 }
 0x81b   : > { %v1814_v17 = vmul.f32 %v3506_v14, %v3490_v40  ;;  %3228 = vmatmul.mubr.msk.bf16.vlgmr.msra.gmra.mxu0 %vm654_vm3, %v1817_v15 }
 0x81c   : > { %3238 = vmatpush3.bf16.xpose.msra.mxu0 %v2075_v18  ;;  %3239 = vmatprep.mubr.msk.bf16.mxu0 %vm3728_vm1, %v3727_v6  ;;  %v2170_v31 = vpop.permute.xlu0 %2169 }
 0x81d   : > { %v1818_v19 = vpack.c.bf16 %v1814_v17, %v1813_v16  ;;  %3249 = vmatprep.subr.bf16.mxu0 %v3727_v6 }
 0x81f   : > { %3234 = vmatmul.mubr.msk.bf16.vlgmr.msra.gmra.mxu1 %vm654_vm3, %v1818_v19 }
 0x820   : > { %3244 = vmatpush3.bf16.xpose.msra.mxu1 %v2126_v22  ;;  %3245 = vmatprep.mubr.msk.bf16.mxu1 %vm3728_vm1, %v3727_v6 }
 0x821   : > { %3255 = vmatprep.subr.bf16.mxu1 %v3727_v6 }
 0x823   : > { %3240 = vmatmul.mubr.msk.bf16.vlgmr.msra.gmra.mxu0 %vm456_vm2, %v2068_v21 }
 0x824   : > { %3250 = vmatpush3.bf16.xpose.msra.mxu0 %v2177_v25  ;;  %3251 = vmatprep.mubr.msk.bf16.mxu0 %vm3728_vm1, %v3727_v6 }
 0x825   : > { %3261 = vmatprep.subr.bf16.mxu0 %v3727_v6 }
 0x827   : > { %3246 = vmatmul.mubr.msk.bf16.vlgmr.msra.gmra.mxu1 %vm456_vm2, %v2119_v29 }
 0x828   : > { %3256 = vmatpush3.bf16.xpose.msra.mxu1 %v2228_v30  ;;  %3257 = vmatprep.mubr.msk.bf16.mxu1 %vm3728_vm1, %v3727_v6 }
 0x829   : > { %3267 = vmatprep.subr.bf16.mxu1 %v3727_v6 }
 0x82b   : > { %3252 = vmatmul.mubr.msk.bf16.vlgmr.msra.gmra.mxu0 %vm456_vm2, %v2170_v31 }
 0x82c   : > { %3263 = vmatprep.mubr.msk.bf16.mxu0 %vm3728_vm1, %v3727_v6 }
 0x82f   : > { %3258 = vmatmul.mubr.msk.bf16.vlgmr.msra.gmra.mxu1 %vm456_vm2, %v2221_v32 }
 0x830   : > { %3269 = vmatprep.mubr.msk.bf16.mxu1 %vm3728_vm1, %v3727_v6 }
 0x8d2   : > { %v4248_v33 = vpop.f32.mrf.mxu0 }
 0x8d4   : > { %v3217_v34 = vpop.f32.mrf.mxu0 }
 0x8d6   : > { %v4250_v35 = vpop.f32.mrf.mxu0 }
 0x8d7   : > { %v4252_v36 = vpop.f32.mrf.mxu1 }
 0x8d8   : > { %v3218_v37 = vpop.f32.mrf.mxu0 }
 0x8d9   : > { %v3223_v38 = vpop.f32.mrf.mxu1 }
 0x8db   : > { %v4254_v39 = vpop.f32.mrf.mxu1  ;;  %v4256_v40 = vpop.f32.mrf.mxu0 }
 0x8dd   : > { %v3224_v41 = vpop.f32.mrf.mxu1  ;;  %v3229_v42 = vpop.f32.mrf.mxu0 }
 0x8df   : > { %v4258_v43 = vpop.f32.mrf.mxu0  ;;  %v4260_v44 = vpop.f32.mrf.mxu1 }
 0x8e1   : > { %v3230_v45 = vpop.f32.mrf.mxu0  ;;  %v3235_v46 = vpop.f32.mrf.mxu1 }
 0x8e3   : > { %v4262_v48 = vpop.f32.mrf.mxu1  ;;  %v2111_v49 = vpop.f32.mrf.mxu0 }
 0x8e4   : > { %v2112_v50 = vadd.f32 %v2111_v49, %v2065_v47 }
 0x8e5   : > { %v3236_v51 = vpop.f32.mrf.mxu1  ;;  %v3241_v52 = vpop.f32.mrf.mxu0 }
 0x8e6   : > { %v2271_v54 = vsel %vm654_vm3, %v2112_v50, -inf }
 0x8e7   : > { %2272 = vmax.xlane.f32.xlu0 %v2271_v54  ;;  %v2114_v55 = vpop.f32.mrf.mxu0  ;;  %v2162_v56 = vpop.f32.mrf.mxu1 }
 0x8e8   : > { %v2115_v57 = vadd.f32 %v2114_v55, %v2066_v53  ;;  %v2163_v58 = vadd.f32 %v2162_v56, %v2065_v47 }
 0x8e9   : > { %v3242_v59 = vpop.f32.mrf.mxu0  ;;  %v3247_v61 = vpop.f32.mrf.mxu1 }
 0x8ea   : > { %v2274_v63 = vsel %vm654_vm3, %v2115_v57, -inf  ;;  %v2277_v1 = vsel %vm654_vm3, %v2163_v58, -inf }
 0x8eb   : > { %2275 = vmax.xlane.f32.xlu1 %v2274_v63  ;;  %2278 = vmax.xlane.f32.xlu0 %v2277_v1  ;;  %v2165_v4 = vpop.f32.mrf.mxu1  ;;  %v2213_v5 = vpop.f32.mrf.mxu0 }
 0x8ec   : > { %v2166_v9 = vadd.f32 %v2165_v4, %v2066_v53  ;;  %v2214_v10 = vadd.f32 %v2213_v5, %v2065_v47 }
 0x8ed   : > { %v3248_v11 = vpop.f32.mrf.mxu1  ;;  %v3253_v13 = vpop.f32.mrf.mxu0 }
 0x8ee   : > { %v2280_v14 = vsel %vm654_vm3, %v2166_v9, -inf  ;;  %v2283_v15 = vsel %vm654_vm3, %v2214_v10, -inf }
 0x8ef   : > { %2281 = vmax.xlane.f32.xlu0 %v2280_v14  ;;  %v2264_v16 = vpop.f32.mrf.mxu1  ;;  %2284 = vmax.xlane.f32.xlu1 %v2283_v15  ;;  %v2216_v17 = vpop.f32.mrf.mxu0 }
 0x8f0   : > { %v2265_v18 = vadd.f32 %v2264_v16, %v2065_v47  ;;  %v2217_v19 = vadd.f32 %v2216_v17, %v2066_v53 }
 0x8f1   : > { %v3254_v20 = vpop.f32.mrf.mxu0  ;;  %v3259_v21 = vpop.f32.mrf.mxu1 }
 0x8f2   : > { %v2289_v22 = vsel %vm654_vm3, %v2265_v18, -inf  ;;  %v2286_v25 = vsel %vm654_vm3, %v2217_v19, -inf }
 0x8f3   : > { %v2267_v28 = vpop.f32.mrf.mxu1  ;;  %2290 = vmax.xlane.f32.xlu1 %v2289_v22  ;;  %2287 = vmax.xlane.f32.xlu0 %v2286_v25 }
 0x8f4   : > { %v2268_v29 = vadd.f32 %v2267_v28, %v2066_v53 }
 0x8f5   : > { %v3260_v30 = vpop.f32.mrf.mxu1 }
 0x8f6   : > { %v2292_v31 = vsel %vm654_vm3, %v2268_v29, -inf  ;;  %v2982_v30 = vpack.c.bf16 %v4170_v2, %v4170_v2  ;;  %v2989_v2 = vpack.c.bf16 %v4252_v36, %v4252_v36  ;;  %v2994_v36 = vpack.c.bf16 %v4262_v48, %v4262_v48 }
 0x8f7   : > { %2293 = vmax.xlane.f32.xlu0 %v2292_v31  ;;  %v2979_v31 = vpack.c.bf16 %v4164_v60, %v4164_v60  ;;  %v2987_v60 = vpack.c.bf16 %v4248_v33, %v4248_v33  ;;  %v2992_v33 = vpack.c.bf16 %v4258_v43, %v4258_v43 }
 0x904   : > { %2363 = vrot.lane.b32.xlu1 %v3952_v23, %s3739_s12 }
 0x970   : > { %v2273_v32 = vpop.xlane.xlu0 %2272 }
 0x971   : > { %v2295_v34 = vsub.f32 %v2112_v50, %v2273_v32 }
 0x973   : > { %v2303_v37 = vmul.f32 1.442695, %v2295_v34 }
 0x974   : > { %v2276_v38 = vpop.xlane.xlu1 %2275  ;;  %v2279_v41 = vpop.xlane.xlu0 %2278 }
 0x975   : > { %3507 = vpow2.f32 %v2303_v37  ;;  %v2296_v42 = vsub.f32 %v2115_v57, %v2276_v38  ;;  %v2297_v45 = vsub.f32 %v2163_v58, %v2279_v41 }
 0x977   : > { %v2305_v46 = vmul.f32 1.442695, %v2296_v42  ;;  %v2307_v47 = vmul.f32 1.442695, %v2297_v45 }
 0x978   : > { %v2285_v49 = vpop.xlane.xlu1 %2284  ;;  %v2282_v51 = vpop.xlane.xlu0 %2281 }
 0x979   : > { %3509 = vpow2.f32 %v2305_v46  ;;  %v2299_v52 = vsub.f32 %v2214_v10, %v2285_v49  ;;  %v2298_v53 = vsub.f32 %v2166_v9, %v2282_v51 }
 0x97a   : > { %3511 = vpow2.f32 %v2307_v47 }
 0x97b   : > { %v2311_v54 = vmul.f32 1.442695, %v2299_v52  ;;  %v2309_v55 = vmul.f32 1.442695, %v2298_v53 }
 0x97c   : > { %v2291_v56 = vpop.xlane.xlu1 %2290  ;;  %v2288_v23 = vpop.xlane.xlu0 %2287 }
 0x97d   : > { %3513 = vpow2.f32 %v2311_v54  ;;  %v2301_v50 = vsub.f32 %v2265_v18, %v2291_v56  ;;  %v2300_v59 = vsub.f32 %v2217_v19, %v2288_v23 }
 0x97e   : > { %3515 = vpow2.f32 %v2309_v55 }
 0x97f   : > { %v2315_v61 = vmul.f32 1.442695, %v2301_v50  ;;  %v2313_v63 = vmul.f32 1.442695, %v2300_v59 }
 0x980   : > { %v2364_v57 = vpop.permute.xlu1 %2363  ;;  %v2294_v58 = vpop.xlane.xlu0 %2293 }
 0x981   : > { %3517 = vpow2.f32 %v2315_v61  ;;  %v2302_v1 = vsub.f32 %v2268_v29, %v2294_v58  ;;  %3262 = vmatpush3.bf16.msra.mxu0 %v2364_v57  ;;  %v2980_v29 = vpack.c.bf16 %v4166_v62, %v4166_v62  ;;  %v2984_v62 = vpack.c.bf16 %v4174_v7, %v4174_v7 }
 0x982   : > { %v4274_v4 = vpop.eup %3507  ;;  %3519 = vpow2.f32 %v2313_v63  ;;  %3273 = vmatprep.subr.bf16.mxu0 %v3727_v6  ;;  %v2985_v7 = vpack.c.bf16 %v4176_v8, %v4176_v8 }
 0x983   : > { %v2317_v5 = vmul.f32 1.442695, %v2302_v1  ;;  %v2319_v9 = vsel %vm654_vm3, %v4274_v4, 0.0 }
 0x984   : > { %2320 = vadd.xlane.f32.xlu1 %v2319_v9 }
 0x985   : > { %3521 = vpow2.f32 %v2317_v5 }
 0x986   : > { %v4279_v10 = vpop.eup %3509 }
 0x987   : > { %v4281_v11 = vpop.eup %3511  ;;  %v2322_v13 = vsel %vm654_vm3, %v4279_v10, 0.0 }
 0x988   : > { %2323 = vadd.xlane.f32.xlu0 %v2322_v13  ;;  %v2325_v14 = vsel %vm654_vm3, %v4281_v11, 0.0 }
 0x989   : > { %2326 = vadd.xlane.f32.xlu1 %v2325_v14 }
 0x98a   : > { %v4287_v15 = vpop.eup %3513 }
 0x98b   : > { %v4289_v16 = vpop.eup %3515  ;;  %v2331_v17 = vsel %vm654_vm3, %v4287_v15, 0.0 }
 0x98c   : > { %v2328_v18 = vsel %vm654_vm3, %v4289_v16, 0.0 }
 0x98d   : > { %2332 = vadd.xlane.f32.xlu1 %v2331_v17  ;;  %2329 = vadd.xlane.f32.xlu0 %v2328_v18 }
 0x98e   : > { %v4295_v19 = vpop.eup %3517 }
 0x98f   : > { %v4297_v20 = vpop.eup %3519  ;;  %v2337_v21 = vsel %vm654_vm3, %v4295_v19, 0.0 }
 0x990   : > { %v2334_v22 = vsel %vm654_vm3, %v4297_v20, 0.0 }
 0x991   : > { %2338 = vadd.xlane.f32.xlu1 %v2337_v21  ;;  %2335 = vadd.xlane.f32.xlu0 %v2334_v22 }
 0x992   : > { %v4303_v25 = vpop.eup %3521 }
 0x993   : > { %v2340_v28 = vsel %vm654_vm3, %v4303_v25, 0.0 }
 0x995   : > { %2341 = vadd.xlane.f32.xlu0 %v2340_v28 }
 0x9a2   : > { %2457 = vrot.lane.b32.xlu1 %v3954_v24, %s3739_s12  ;;  %v2988_v24 = vpack.c.bf16 %v4250_v35, %v4250_v35  ;;  %v2983_v35 = vpack.c.bf16 %v4172_v3, %v4172_v3  ;;  %v2993_v3 = vpack.c.bf16 %v4260_v44, %v4260_v44 }
 0x9a6   : > { %2504 = vrot.lane.b32.xlu1 %v3960_v27, %s3739_s12  ;;  %v2981_v27 = vpack.c.bf16 %v4168_v0, %v4168_v0  ;;  %v2986_v0 = vpack.c.bf16 %v4178_v12, %v4178_v12  ;;  %v2991_v12 = vpack.c.bf16 %v4256_v40, %v4256_v40 }
 0x9aa   : > { %1489 = vrot.lane.b32.xlu1 %v2980_v29, %s3740_s26  ;;  %v3405_v29 = vld [vmem:[#allocation8 + $0x8] sm:$0xff]  }
 0x9ab   : > { %2410 = vrot.lane.b32.xlu0 %v3958_v26, %s3739_s12  ;;  %v2990_v26 = vpack.c.bf16 %v4254_v39, %v4254_v39  ;;  %s3743_s12 = smov [#allocation11]  }
 0x9ae   : > { %1493 = vrot.lane.b32.xlu1 %v2982_v30, %s3740_s26 }
 0x9af   : > { %1487 = vrot.lane.b32.xlu0 %v2979_v31, %s3740_s26 }
 0x9b2   : > { %2033 = vrot.lane.b32.xlu1 %v2988_v24, %s3741_s27 }
 0x9b3   : > { %1491 = vrot.lane.b32.xlu0 %v2981_v27, %s3740_s26  ;;  %v3406_v27 = vld [vmem:[#allocation8] sm:$0xff]  }
 0x9b6   : > { %2037 = vrot.lane.b32.xlu1 %v2990_v26, %s3741_s27 }
 0x9b7   : > { %2031 = vrot.lane.b32.xlu0 %v2987_v60, %s3741_s27 }
 0x9ba   : > { %1497 = vrot.lane.b32.xlu1 %v2984_v62, %s3740_s26 }
 0x9bb   : > { %2035 = vrot.lane.b32.xlu0 %v2989_v2, %s3741_s27 }
 0x9be   : > { %1501 = vrot.lane.b32.xlu1 %v2986_v0, %s3740_s26 }
 0x9bf   : > { %1495 = vrot.lane.b32.xlu0 %v2983_v35, %s3740_s26 }
 0x9c2   : > { %2041 = vrot.lane.b32.xlu1 %v2992_v33, %s3741_s27 }
 0x9c3   : > { %1499 = vrot.lane.b32.xlu0 %v2985_v7, %s3740_s26 }
 0x9c6   : > { %2045 = vrot.lane.b32.xlu1 %v2994_v36, %s3741_s27 }
 0x9c7   : > { %2039 = vrot.lane.b32.xlu0 %v2991_v12, %s3741_s27 }
 0x9cb   : > { %2043 = vrot.lane.b32.xlu0 %v2993_v3, %s3741_s27  ;;  %s3649_s27 = sshll.u32 %s3743_s12, 4  ;;  %s3650_s27 = int_to_ptr.vmem [resolvable:$false] %s3649_s27 }
 0x9cc   : > { %p3652_p12 = scmp.lt.s32.totalorder %s4423_s8, %s3650_s27 }
 0xa0d   : > { %v2321_v39 = vpop.xlane.xlu1 %2320 }
 0xa0e   : > { %3523 = vrcp.f32 %v2321_v39 }
 0xa11   : > { %v2324_v43 = vpop.xlane.xlu0 %2323 }
 0xa12   : > { %v2327_v32 = vpop.xlane.xlu1 %2326  ;;  %3525 = vrcp.f32 %v2324_v43 }
 0xa13   : > { %3527 = vrcp.f32 %v2327_v32 }
 0xa16   : > { %v2333_v8 = vpop.xlane.xlu1 %2332  ;;  %v2330_v34 = vpop.xlane.xlu0 %2329 }
 0xa17   : > { %3529 = vrcp.f32 %v2330_v34 }
 0xa18   : > { %3531 = vrcp.f32 %v2333_v8 }
 0xa1a   : > { %v2339_v48 = vpop.xlane.xlu1 %2338  ;;  %v2336_v37 = vpop.xlane.xlu0 %2335 }
 0xa1b   : > { %3533 = vrcp.f32 %v2336_v37  ;;  %v3524_v40 = vpop.eup %3523 }
 0xa1c   : > { %3535 = vrcp.f32 %v2339_v48  ;;  %v2351_v44 = vmul.f32 %v3524_v40, %v4274_v4 }
 0xa1e   : > { %v2458_v38 = vpop.permute.xlu1 %2457  ;;  %v2342_v41 = vpop.xlane.xlu0 %2341 }
 0xa1f   : > { %v3526_v42 = vpop.eup %3525  ;;  %3537 = vrcp.f32 %v2342_v41 }
 0xa20   : > { %v2352_v45 = vmul.f32 %v3526_v42, %v4279_v10  ;;  %v3528_v51 = vpop.eup %3527 }
 0xa21   : > { %v2353_v55 = vmul.f32 %v3528_v51, %v4281_v11 }
 0xa22   : > { %v2505_v46 = vpop.permute.xlu1 %2504  ;;  %v2411_v47 = vpop.permute.xlu0 %2410  ;;  %v2359_v49 = vpack.c.bf16 %v2352_v45, %v2351_v44 }
 0xa23   : > { %3268 = vmatpush3.bf16.msra.mxu1 %v2411_v47 }
 0xa24   : > { %3264 = vmatmul.mubr.msk.bf16.vlgmr.msra.gmra.mxu0 %vm654_vm3, %v2359_v49  ;;  %3279 = vmatprep.subr.bf16.mxu1 %v3727_v6  ;;  %v3530_v52 = vpop.eup %3529 }
 0xa25   : > { %3274 = vmatpush3.bf16.msra.mxu0 %v2458_v38  ;;  %3275 = vmatprep.mubr.msk.bf16.mxu0 %vm3728_vm1, %v3727_v6  ;;  %v2354_v56 = vmul.f32 %v3530_v52, %v4289_v16  ;;  %v3532_v23 = vpop.eup %3531 }
 0xa26   : > { %v1490_v53 = vpop.permute.xlu1 %1489  ;;  %v1488_v54 = vpop.permute.xlu0 %1487  ;;  %v2355_v58 = vmul.f32 %v3532_v23, %v4287_v15  ;;  %3285 = vmatprep.subr.bf16.mxu0 %v3405_v29 }
 0xa27   : > { %1513 = vst.msk [vmem:[#allocation2 + $0x4] sm:$0xf] %vm1511_vm5, %v1490_v53  ;;  %1512 = vst.msk [vmem:[#allocation2] sm:$0xf] %vm1511_vm5, %v1488_v54  ;;  %v2360_v50 = vpack.c.bf16 %v2354_v56, %v2353_v55  ;;  %v2952_v56 = vld [vmem:[%s4471_s4] ss:$0 sm:$0xff] }
 0xa28   : > { %v3534_v59 = vpop.eup %3533 }
 0xa29   : > { %v3536_v61 = vpop.eup %3535  ;;  %3270 = vmatmul.mubr.msk.bf16.vlgmr.msra.gmra.mxu1 %vm654_vm3, %v2360_v50  ;;  %v2356_v1 = vmul.f32 %v3534_v59, %v4297_v20 }
 0xa2a   : > { %v1494_v63 = vpop.permute.xlu1 %1493  ;;  %v1492_v57 = vpop.permute.xlu0 %1491  ;;  %3280 = vmatpush3.bf16.msra.mxu1 %v2505_v46  ;;  %3281 = vmatprep.mubr.msk.bf16.mxu1 %vm3728_vm1, %v3727_v6  ;;  %v2357_v9 = vmul.f32 %v3536_v61, %v4295_v19 }
 0xa2b   : > { %1515 = vst.msk [vmem:[#allocation2 + $0xc] sm:$0xf] %vm1511_vm5, %v1494_v63  ;;  %1514 = vst.msk [vmem:[#allocation2 + $0x8] sm:$0xf] %vm1511_vm5, %v1492_v57  ;;  %v2361_v5 = vpack.c.bf16 %v2356_v1, %v2355_v58 }
 0xa2c   : > { %v3538_v4 = vpop.eup %3537 }
 0xa2d   : > { %v2358_v10 = vmul.f32 %v3538_v4, %v4303_v25  ;;  %3276 = vmatmul.mubr.msk.bf16.vlgmr.msra.gmra.mxu0 %vm654_vm3, %v2361_v5 }
 0xa2e   : > { %v2034_v11 = vpop.permute.xlu1 %2033  ;;  %v2032_v13 = vpop.permute.xlu0 %2031  ;;  %3286 = vmatpush3.bf16.msra.mxu0 %v3405_v29 }
 0xa2f   : > { %2057 = vst.msk [vmem:[#allocation2 + $0x4] sm:$0xf] %vm2055_vm6, %v2034_v11  ;;  %2056 = vst.msk [vmem:[#allocation2] sm:$0xf] %vm2055_vm6, %v2032_v13  ;;  %v2362_v14 = vpack.c.bf16 %v2358_v10, %v2357_v9  ;;  %3287 = vmatprep.subr.bf16.mxu0 %v3406_v27 }
 0xa31   : > { %3282 = vmatmul.mubr.msk.bf16.vlgmr.msra.gmra.mxu1 %vm654_vm3, %v2362_v14 }
 0xa32   : > { %v2038_v15 = vpop.permute.xlu1 %2037  ;;  %v2036_v6 = vpop.permute.xlu0 %2035  ;;  %3288 = vmatpush3.bf16.msra.mxu0 %v3406_v27 }
 0xa33   : > { %2059 = vst.msk [vmem:[#allocation2 + $0xc] sm:$0xf] %vm2055_vm6, %v2038_v15  ;;  %2058 = vst.msk [vmem:[#allocation2 + $0x8] sm:$0xf] %vm2055_vm6, %v2036_v6 }
 0xa36   : > { %v1498_v16 = vpop.permute.xlu1 %1497  ;;  %v1496_v17 = vpop.permute.xlu0 %1495 }
 0xa37   : > { %1517 = vst.msk [vmem:[#allocation2 + $0x14] sm:$0xf] %vm1511_vm5, %v1498_v16  ;;  %1516 = vst.msk [vmem:[#allocation2 + $0x10] sm:$0xf] %vm1511_vm5, %v1496_v17 }
 0xa3a   : > { %v1502_v18 = vpop.permute.xlu1 %1501  ;;  %v1500_v19 = vpop.permute.xlu0 %1499 }
 0xa3b   : > { %1519 = vst.msk [vmem:[#allocation2 + $0x1c] sm:$0xf] %vm1511_vm5, %v1502_v18  ;;  %1518 = vst.msk [vmem:[#allocation2 + $0x18] sm:$0xf] %vm1511_vm5, %v1500_v19 }
 0xa3e   : > { %v2042_v20 = vpop.permute.xlu1 %2041  ;;  %v2040_v21 = vpop.permute.xlu0 %2039 }
 0xa3f   : > { %2061 = vst.msk [vmem:[#allocation2 + $0x14] sm:$0xf] %vm2055_vm6, %v2042_v20  ;;  %2060 = vst.msk [vmem:[#allocation2 + $0x10] sm:$0xf] %vm2055_vm6, %v2040_v21 }
 0xa42   : > { %v2046_v22 = vpop.permute.xlu1 %2045  ;;  %v2044_v25 = vpop.permute.xlu0 %2043 }
 0xa43   : > { %2063 = vst.msk [vmem:[#allocation2 + $0x1c] sm:$0xf] %vm2055_vm6, %v2046_v22  ;;  %2062 = vst.msk [vmem:[#allocation2 + $0x18] sm:$0xf] %vm2055_vm6, %v2044_v25 }
 0xae4   : > { %v2403_v28 = vpop.f32.mrf.mxu0 }
 0xae5   : > { %v2995_v30 = vpack.c.bf16 %v2403_v28, %v2403_v28 }
 0xae6   : > { %v3265_v31 = vpop.f32.mrf.mxu0 }
 0xae7   : > { %2575 = vrot.lane.b32.xlu0 %v2995_v30, %s3742_s29 }
 0xae8   : > { %v2406_v24 = vpop.f32.mrf.mxu0 }
 0xae9   : > { %v2996_v26 = vpack.c.bf16 %v2406_v24, %v2406_v24  ;;  %v2450_v60 = vpop.f32.mrf.mxu1 }
 0xaea   : > { %v3266_v62 = vpop.f32.mrf.mxu0  ;;  %v2997_v2 = vpack.c.bf16 %v2450_v60, %v2450_v60 }
 0xaeb   : > { %2577 = vrot.lane.b32.xlu1 %v2996_v26, %s3742_s29  ;;  %v3271_v0 = vpop.f32.mrf.mxu1 }
 0xaec   : > { %2579 = vrot.lane.b32.xlu0 %v2997_v2, %s3742_s29 }
 0xaed   : > { %v2453_v35 = vpop.f32.mrf.mxu1  ;;  %v2497_v33 = vpop.f32.mrf.mxu0 }
 0xaee   : > { %v2998_v7 = vpack.c.bf16 %v2453_v35, %v2453_v35  ;;  %v2999_v36 = vpack.c.bf16 %v2497_v33, %v2497_v33 }
 0xaef   : > { %v3272_v12 = vpop.f32.mrf.mxu1  ;;  %v3277_v3 = vpop.f32.mrf.mxu0 }
 0xaf0   : > { %2583 = vrot.lane.b32.xlu0 %v2999_v36, %s3742_s29  ;;  %2581 = vrot.lane.b32.xlu1 %v2998_v7, %s3742_s29 }
 0xaf1   : > { %v2500_v39 = vpop.f32.mrf.mxu0  ;;  %v2544_v43 = vpop.f32.mrf.mxu1 }
 0xaf2   : > { %v3000_v32 = vpack.c.bf16 %v2500_v39, %v2500_v39  ;;  %v3001_v8 = vpack.c.bf16 %v2544_v43, %v2544_v43 }
 0xaf3   : > { %v3278_v34 = vpop.f32.mrf.mxu0  ;;  %v3283_v48 = vpop.f32.mrf.mxu1 }
 0xaf4   : > { %2585 = vrot.lane.b32.xlu1 %v3000_v32, %s3742_s29  ;;  %2587 = vrot.lane.b32.xlu0 %v3001_v8, %s3742_s29 }
 0xaf5   : > { %v2547_v37 = vpop.f32.mrf.mxu1 }
 0xaf6   : > { %v3002_v40 = vpack.c.bf16 %v2547_v37, %v2547_v37 }
 0xaf7   : > { %v3284_v38 = vpop.f32.mrf.mxu1 }
 0xaf8   : > { %2589 = vrot.lane.b32.xlu1 %v3002_v40, %s3742_s29  ;;  %s3651_s29 = scalar_lea.vmem %s3650_s27, 2048 }
 0xaf9   : > { %p3653_p13 = scmp.lt.s32.totalorder %s3651_s29, %s3645_s15 }
 0xafb   : > { %p3654_p2 = por %p3653_p13, %p3652_p12 }
 0xafd   : > { %p3655_p5 = pnand %p3654_p2, %p3648_p9 }
 0xb59   : > { %v2576_v41 = vpop.permute.xlu0 %2575 }
 0xb5a   : > { %2600 = vst.msk [vmem:[#allocation2] sm:$0xf] %vm2599_vm7, %v2576_v41 }
 0xb5d   : > { %v2578_v42 = vpop.permute.xlu1 %2577 }
 0xb5e   : > { %2601 = vst.msk [vmem:[#allocation2 + $0x4] sm:$0xf] %vm2599_vm7, %v2578_v42  ;;  %v2580_v44 = vpop.permute.xlu0 %2579 }
 0xb5f   : > { %2602 = vst.msk [vmem:[#allocation2 + $0x8] sm:$0xf] %vm2599_vm7, %v2580_v44 }
 0xb62   : > { %v2582_v45 = vpop.permute.xlu1 %2581  ;;  %v2584_v46 = vpop.permute.xlu0 %2583 }
 0xb63   : > { %2603 = vst.msk [vmem:[#allocation2 + $0xc] sm:$0xf] %vm2599_vm7, %v2582_v45  ;;  %2604 = vst.msk [vmem:[#allocation2 + $0x10] sm:$0xf] %vm2599_vm7, %v2584_v46 }
 0xb65   : > { %v3407_v47 = vld [vmem:[#allocation2] sm:$0xff]  }
 0xb66   : > { %v2586_v49 = vpop.permute.xlu1 %2585  ;;  %v2588_v51 = vpop.permute.xlu0 %2587  ;;  %3289 = vmatprep.mubr.msk.bf16.mxu0 %vm369_vm0, %v3407_v47 }
 0xb67   : > { %2605 = vst.msk [vmem:[#allocation2 + $0x14] sm:$0xf] %vm2599_vm7, %v2586_v49  ;;  %2606 = vst.msk [vmem:[#allocation2 + $0x18] sm:$0xf] %vm2599_vm7, %v2588_v51 }
 0xb6a   : > { %v2590_v52 = vpop.permute.xlu1 %2589  ;;  %v3408_v53 = vld [vmem:[#allocation2 + $0x8] sm:$0xff]  }
 0xb6b   : > { %2607 = vst.msk [vmem:[#allocation2 + $0x1c] sm:$0xf] %vm2599_vm7, %v2590_v52  ;;  %3290 = vmatmul.mubr.msk.bf16.vlgmr.msra.gmra.mxu0 %vm369_vm0, %v3408_v53 }
 0xb6e   : > { %v3409_v54 = vld [vmem:[#allocation2 + $0x10] sm:$0xff]  }
 0xb6f   : > { %3293 = vmatprep.mubr.msk.bf16.mxu0 %vm369_vm0, %v3409_v54 }
 0xb72   : > { %v3410_v55 = vld [vmem:[#allocation2 + $0x18] sm:$0xff]  }
 0xb73   : > { %3294 = vmatmul.mubr.msk.bf16.gmra.mxu0 %vm369_vm0, %v3410_v55 }
 0xc2b   : > { %v3291_v23 = vpop.f32.mrf.mxu0 }
 0xc2c   : > { %v2714_v50 = vadd.f32 %v3291_v23, %v2952_v56 }
 0xc2d   : > { %v2705_v59 = vpop.f32.mrf.mxu0 }
 0xc2e   : > { %2738 = vst.msk [vmem:[%s314_s13 + $0x10] sm:$0xff] %vm369_vm0, %v2714_v50  ;;  %v2706_v61 = vadd.f32 %v2952_v56, %v2705_v59 }
 0xc2f   : > { %v3292_v63 = vpop.f32.mrf.mxu0 }
 0xc30   : > { %2736 = vst.msk [vmem:[%s314_s13] sm:$0xff] %vm369_vm0, %v2706_v61  ;;  %v2717_v57 = vadd.f32 %v3292_v63, %v2952_v56 }
 0xc31   : > { %v2708_v58 = vpop.f32.mrf.mxu0 }
 0xc32   : > { %2739 = vst.msk [vmem:[%s314_s13 + $0x18] sm:$0xff] %vm369_vm0, %v2717_v57  ;;  %v2709_v1 = vadd.f32 %v2952_v56, %v2708_v58 }
 0xc33   : > { %v3295_v4 = vpop.f32.mrf.mxu0 }
 0xc34   : > { %2737 = vst.msk [vmem:[%s314_s13 + $0x8] sm:$0xff] %vm369_vm0, %v2709_v1  ;;  %v2730_v5 = vadd.f32 %v3295_v4, %v2952_v56 }
 0xc35   : > { %v2721_v9 = vpop.f32.mrf.mxu0 }
 0xc36   : > { %2742 = vst.msk [vmem:[%s314_s13 + $0x30] sm:$0xff] %vm369_vm0, %v2730_v5  ;;  %v2722_v10 = vadd.f32 %v2952_v56, %v2721_v9 }
 0xc37   : > { %v3296_v11 = vpop.f32.mrf.mxu0 }
 0xc38   : > { %2740 = vst.msk [vmem:[%s314_s13 + $0x20] sm:$0xff] %vm369_vm0, %v2722_v10  ;;  %v2733_v13 = vadd.f32 %v3296_v11, %v2952_v56 }
 0xc39   : > { %v2724_v14 = vpop.f32.mrf.mxu0 }
 0xc3a   : > { %2743 = vst.msk [vmem:[%s314_s13 + $0x38] sm:$0xff] %vm369_vm0, %v2733_v13  ;;  %v2725_v15 = vadd.f32 %v2952_v56, %v2724_v14 }
 0xc3c   : > { %2741 = vst.msk [vmem:[%s314_s13 + $0x28] sm:$0xff] %vm369_vm0, %v2725_v15 }
 0xc3d   : > { %3658 = shalt.err (!%p3655_p5)
}
 0xc3e   : > { %s3659_s30 = scalar_lea.hbm %s4420_s20, 1024  ;;  %s3663_s13 = scalar_lea.hbm %s4473_s6, 4096 }
 0xc3f   : > { %p3660_p6 = scmp.ne.s32.totalorder %s4420_s20, %s3659_s30  ;;  %p3664_p0 = scmp.lt.s32.totalorder %s4420_s20, %s4473_s6 }
 0xc40   : > { %p3665_p10 = scmp.lt.s32.totalorder %s3663_s13, %s3659_s30 }
 0xc41   : > { %p3661_p4 = pnand %p3660_p6, %p4494_p1 }
 0xc42   : > { %p3666_p3 = por %p3665_p10, %p3664_p0 }
 0xc43   : > { %p3662_p8 = pneg %p3661_p4 }
 0xc45   : > { %p3667_p7 = pnand %p3666_p3, %p3662_p8 }
 0xc47   : > { %3670 = shalt.err (!%p3667_p7)
}
 0xc48   : > { %s3744_s16 = smov 128  }
 0xc49   : > { %3315 = dma.vmem_to_hbm [thread:$0]  (%p4494_p1), %s4423_s8, 1024, %s4420_s20, %s2745_s25, %s3744_s16, %s3744_s16, %s3740_s26  }
 0xc4a PF: > { %p3342_p11 = scmp.ge.s32.totalorder %s3717_s24, 2  ;;  %s2774_s15 = sand.u32 1, %s3705_s21  }
 0xc4b   : > { %p4495_p9 = scmp.ne.s32.totalorder %s4481_s28, 0  ;;  %s2775_s12 = scalar_lea.sflag [#allocation5], %s2774_s15 }
 0xc4d   : > { %p3332_p12 = pnand %p3342_p11, %p4495_p9 }
 0xc4f   : > { %p3333_p13 = pneg %p3332_p12 }
 0xc51   : > { %3700 = dma.done.wait (%p3333_p13), %s2775_s12, 1024  }
 0xc52   : > { %3702 = vsyncadd (%p3333_p13), %s2775_s12, 4294966272  ;;  %p21_p2 = scmp.ge.s32.totalorder %s3865_s11, 6   ;;  %s4496_s21 = smov %s3709_s22 }
 0xc53   : > { %s4497_s22 = smov %s3713_s23  ;;  %s4498_s23 = smov %s3875_s17 }
 0xc54   : > { %s4499_s24 = smov %s3865_s11  ;;  %23 = sbr.rel (!%p21_p2) target bundleno = 7 (0x7), region = 104 }
 0xc59   :  { %2780 = vsyncpa [#allocation4], 1 }
 0xc5a   :  { %2782 = vsyncpa [#allocation4 + $0x1], 1 }
 0xc5b   :  { %2783 = vsyncpa [#allocation7], 1 }
 0xc5c   :  { %2784 = vsyncpa [#allocation10], 1 }
 0xc5d   :  { %2785 = vsyncpa [#allocation5], 1 }
 0xc5e   :  { %2787 = vsyncpa [#allocation5 + $0x1], 1 }

</bundles_post_ra>
